<compile_context>
chip_gen: v7x
topology: tpu7x:2x2x1
jax: 0.10.0
libtpu: 0.0.40
codegen_flags: <defaults>
</compile_context>

<pallas_src>
import functools
import math

import jax
import jax.numpy as jnp
from jax.experimental import pallas as pl
from jax.experimental.pallas import tpu as pltpu


def _round_up(x, m):
    return ((x + m - 1) // m) * m


# ---------------------------------------------------------------------------
# Fused Pallas kernel: whole SA_adapt forward for one image per grid step.
# ---------------------------------------------------------------------------
def _sa_adapt_kernel(x_ref, wxa_ref, b1_ref, w2_ref, b2_ref, w3_ref, b3_ref,
                     w4_ref, b4_ref, o_ref, *, H, W, C, Cp, C4p, PAD):
    HW = H * W

    # Horizontal (kw = +/-1) validity masks.  The zero pad of width PAD >= W+1
    # already zeroes the vertical (kh = +/-1) out-of-image taps, so only the
    # two column masks are load-bearing.
    pos = jax.lax.broadcasted_iota(jnp.int32, (1, HW), 1)
    ww = pos % W
    mask_l = (ww > 0).astype(jnp.bfloat16)        # valid pixels for kw = -1 taps
    mask_r = (ww < W - 1).astype(jnp.bfloat16)    # valid pixels for kw = +1 taps

    bmask = {}

    def masks_for(cin_p):
        # One broadcast per distinct channel count (hoisted out of the tap loop).
        if cin_p not in bmask:
            bmask[cin_p] = (jnp.broadcast_to(mask_l, (cin_p, HW)),
                            jnp.broadcast_to(mask_r, (cin_p, HW)))
        return bmask[cin_p]

    def conv3x3(v_bf16, w_bf16):
        """3x3 'same' conv: v (cin_p, HW) bf16, w (cout, 9*cin_p) bf16 -> f32."""
        cin_p = v_bf16.shape[0]
        ml, mr = masks_for(cin_p)
        zpad = jnp.zeros((cin_p, PAD), jnp.bfloat16)
        vp = jnp.concatenate([zpad, v_bf16, zpad], axis=1)     # (cin_p, HW + 2*PAD)
        slabs = []
        for t in range(9):
            kh, kw = divmod(t, 3)
            off = PAD + (kh - 1) * W + (kw - 1)                # >= 0 since PAD >= W+1
            s = vp[:, off:off + HW]                            # (cin_p, HW) bf16
            if kw == 0:
                s = s * ml
            elif kw == 2:
                s = s * mr
            slabs.append(s)
        col = jnp.concatenate(slabs, axis=0)                   # (9*cin_p, HW) bf16
        # TODO(synk): for large row tiles, write slabs into a bf16 VMEM scratch
        #             (scratch_shapes) to cut peak VMEM instead of this concat.
        return jnp.dot(w_bf16, col, preferred_element_type=jnp.float32)

    x32 = x_ref[0]                                             # (C, HW) f32
    xb = x32.astype(jnp.bfloat16)
    if Cp > C:
        xb = jnp.concatenate(
            [xb, jnp.zeros((Cp - C, HW), jnp.bfloat16)], axis=0)

    # Shared im2col of x: [adapt conv ; mask conv1] in ONE matmul (M = C + C4p).
    acc = conv3x3(xb, wxa_ref[...])                            # (C + C4p, HW) f32
    adapted = acc[:C]                                          # routed SA_conv, no bias
    h = jnp.maximum(acc[C:] + b1_ref[...], 0.0)                # (C4p, HW); padded rows stay 0

    # Remaining mask branch: (conv+BN+ReLU) x2, conv+BN+Sigmoid (BN pre-folded,
    # channels zero-padded to C4p so each conv is one K = 9*C4p matmul).
    h = jnp.maximum(conv3x3(h.astype(jnp.bfloat16), w2_ref[...]) + b2_ref[...], 0.0)
    h = jnp.maximum(conv3x3(h.astype(jnp.bfloat16), w3_ref[...]) + b3_ref[...], 0.0)
    mask = jax.nn.sigmoid(conv3x3(h.astype(jnp.bfloat16), w4_ref[...]) + b4_ref[...])

    out = x32 + adapted * mask                                 # (C, HW) f32
    o_ref[...] = out[None].astype(o_ref.dtype)


# ---------------------------------------------------------------------------
# Parameter setup / glue (plain JAX)
# ---------------------------------------------------------------------------
def _uniform(key, shape, bound):
    return jax.random.uniform(key, shape, jnp.float32, -bound, bound)


def init_params(key, channels, num_experts=4):
    c4 = channels // 4
    ks = jax.random.split(key, 32)
    ki = iter(ks)
    p = {}

    # mask branch: 4 conv3x3 (with bias), each followed by BatchNorm (eval mode)
    conv_dims = [(channels, c4), (c4, c4), (c4, c4), (c4, 1)]
    p["mask"] = []
    for (cin, cout) in conv_dims:
        fan_in = cin * 9
        bound_w = math.sqrt(6.0 / ((1 + 5) * fan_in))          # kaiming_uniform a=sqrt(5)
        w = _uniform(next(ki), (cout, cin, 3, 3), bound_w)
        b = _uniform(next(ki), (cout,), 1.0 / math.sqrt(fan_in))
        gamma = 1.0 + 0.1 * _uniform(next(ki), (cout,), 1.0)
        beta = 0.1 * _uniform(next(ki), (cout,), 1.0)
        mean = 0.1 * _uniform(next(ki), (cout,), 1.0)
        var = 1.0 + 0.1 * jax.random.uniform(next(ki), (cout,), jnp.float32)
        p["mask"].append(dict(w=w, b=b, gamma=gamma, beta=beta, mean=mean, var=var))

    # SA_conv routing MLP: Linear(2, C) -> ReLU -> Linear(C, E) -> Softmax
    p["r_w1"] = _uniform(next(ki), (channels, 2), 1.0 / math.sqrt(2))
    p["r_b1"] = _uniform(next(ki), (channels,), 1.0 / math.sqrt(2))
    p["r_w2"] = _uniform(next(ki), (num_experts, channels), 1.0 / math.sqrt(channels))
    p["r_b2"] = _uniform(next(ki), (num_experts,), 1.0 / math.sqrt(channels))

    # expert weight pool: (E, Cout, Cin, 3, 3), kaiming_uniform a=sqrt(5), no bias
    fan_in = channels * 9
    bound_w = math.sqrt(6.0 / ((1 + 5) * fan_in))
    p["weight_pool"] = _uniform(next(ki), (num_experts, channels, channels, 3, 3), bound_w)
    return p


def fold_bn(w_oihw, b, gamma, beta, mean, var, eps=1e-5):
    """Fold eval-mode BatchNorm into the preceding conv's weight/bias."""
    s = gamma / jnp.sqrt(var + eps)
    return w_oihw * s[:, None, None, None], (b - mean) * s + beta


def _flatten_w(w_oihw, cin_p):
    """(Cout, Cin, 3, 3) -> (Cout, 9*cin_p); column order (kh, kw, cin_p)."""
    cout, cin = w_oihw.shape[0], w_oihw.shape[1]
    if cin_p > cin:
        w_oihw = jnp.pad(w_oihw, ((0, 0), (0, cin_p - cin), (0, 0), (0, 0)))
    return jnp.transpose(w_oihw, (0, 2, 3, 1)).reshape(cout, 9 * cin_p)


def _pad_rows(a, rows):
    if a.shape[0] == rows:
        return a
    return jnp.pad(a, ((0, rows - a.shape[0]),) + ((0, 0),) * (a.ndim - 1))


def _fused_adapt_weight(params, scale):
    """SA_conv routing MLP + expert mix (scalar/weight-sized -> plain JAX)."""
    s = jnp.full((1, 1), 1.0, jnp.float32) / scale
    inp = jnp.concatenate([s, s], axis=1)                        # (1, 2)
    hid = jax.nn.relu(inp @ params["r_w1"].T + params["r_b1"])   # (1, C)
    logits = hid @ params["r_w2"].T + params["r_b2"]             # (1, E)
    rw = jax.nn.softmax(logits, axis=1)[0]                       # (E,)
    return jnp.sum(params["weight_pool"] * rw[:, None, None, None, None], axis=0)


def sa_adapt_forward(params, x_nchw, scale):
    """Pallas implementation of SA_adapt.forward.  x is NCHW float32."""
    N, C, H, W = x_nchw.shape
    HW = H * W
    C4 = C // 4
    Cp = _round_up(C, 8)          # channel padding for the x im2col
    C4p = _round_up(C4, 8)        # channel padding for the mask-branch convs
    PAD = _round_up(W + 1, 128)   # lane-aligned halo pad (>= W+1: correctness)
    x_flat = x_nchw.reshape(N, C, HW)

    # Fold BN into the mask convs.
    folded = []
    for layer in params["mask"]:
        folded.append(fold_bn(layer["w"], layer["b"], layer["gamma"],
                              layer["beta"], layer["mean"], layer["var"]))
    (w1, b1), (w2, b2), (w3, b3), (w4, b4) = folded
    wa = _fused_adapt_weight(params, scale)

    # [adapt ; mask-conv1] share x's im2col -> one (C + C4p, 9*Cp) bf16 weight.
    wxa = jnp.concatenate(
        [_flatten_w(wa, Cp), _pad_rows(_flatten_w(w1, Cp), C4p)],
        axis=0).astype(jnp.bfloat16)
    b1p = _pad_rows(b1.reshape(-1, 1), C4p).astype(jnp.float32)
    w2p = _pad_rows(_flatten_w(w2, C4p), C4p).astype(jnp.bfloat16)
    b2p = _pad_rows(b2.reshape(-1, 1), C4p).astype(jnp.float32)
    w3p = _pad_rows(_flatten_w(w3, C4p), C4p).astype(jnp.bfloat16)
    b3p = _pad_rows(b3.reshape(-1, 1), C4p).astype(jnp.float32)
    w4p = _flatten_w(w4, C4p).astype(jnp.bfloat16)               # (1, 9*C4p)
    b4p = b4.reshape(1, 1).astype(jnp.float32)

    kernel = functools.partial(_sa_adapt_kernel, H=H, W=W, C=C,
                               Cp=Cp, C4p=C4p, PAD=PAD)
    full = lambda a: pl.BlockSpec(a.shape, lambda n: (0,) * a.ndim)
    out_flat = pl.pallas_call(
        kernel,
        out_shape=jax.ShapeDtypeStruct((N, C, HW), x_nchw.dtype),
        grid=(N,),
        in_specs=[pl.BlockSpec((1, C, HW), lambda n: (n, 0, 0)),
                  full(wxa), full(b1p),
                  full(w2p), full(b2p),
                  full(w3p), full(b3p),
                  full(w4p), full(b4p)],
        out_specs=pl.BlockSpec((1, C, HW), lambda n: (n, 0, 0)),
        compiler_params=pltpu.CompilerParams(
            dimension_semantics=("parallel",),      # batch axis -> megacore on v7x
            vmem_limit_bytes=32 * 1024 * 1024),
    )(x_flat, wxa, b1p, w2p, b2p, w3p, b3p, w4p, b4p)
    return out_flat.reshape(N, C, H, W)


# ---------------------------------------------------------------------------
# Pure-JAX reference (mirrors the kernel's bf16-operand / f32-accum matmuls)
# ---------------------------------------------------------------------------
def _ref_conv3x3(x_nchw, w_oihw, b=None):
    xq = x_nchw.astype(jnp.bfloat16).astype(jnp.float32)
    wq = w_oihw.astype(jnp.bfloat16).astype(jnp.float32)
    out = jax.lax.conv_general_dilated(
        xq, wq, window_strides=(1, 1), padding="SAME",
        dimension_numbers=("NCHW", "OIHW", "NCHW"))
    if b is not None:
        out = out + b[None, :, None, None]
    return out


def sa_adapt_reference(params, x_nchw, scale):
    h = x_nchw
    for i, layer in enumerate(params["mask"]):
        w_f, b_f = fold_bn(layer["w"], layer["b"], layer["gamma"],
                           layer["beta"], layer["mean"], layer["var"])
        h = _ref_conv3x3(h, w_f, b_f)
        h = jax.nn.sigmoid(h) if i == 3 else jax.nn.relu(h)
    mask = h                                                     # (N, 1, H, W)
    adapted = _ref_conv3x3(x_nchw, _fused_adapt_weight(params, scale))
    return x_nchw + adapted * mask


# ---------------------------------------------------------------------------
if __name__ == "__main__":
    N, C, H, W = 2, 8, 16, 16
    num_experts = 4
    scale = 2.0

    key = jax.random.PRNGKey(0)
    k_x, k_p = jax.random.split(key)
    x = jax.random.normal(k_x, (N, C, H, W), jnp.float32)
    params = init_params(k_p, C, num_experts)

    fwd = jax.jit(sa_adapt_forward)
    out = jax.block_until_ready(fwd(params, x, scale))
    ref = jax.block_until_ready(sa_adapt_reference(params, x, scale))

    assert out.shape == (N, C, H, W)
    err = jnp.max(jnp.abs(out - ref))
    assert jnp.allclose(out, ref, atol=5e-3, rtol=5e-3), f"max abs err {err}"

    print("KERNEL_OK")
</pallas_src>

<mosaic_0001>
module attributes {stable_mosaic.version = 11 : i64} {
  func.func @_sa_adapt_kernel(%arg0: i32, %arg1: memref<1x8x256xf32, #tpu.memory_space<vmem>>, %arg2: memref<16x72xbf16, #tpu.memory_space<vmem>>, %arg3: memref<8x1xf32, #tpu.memory_space<vmem>>, %arg4: memref<8x72xbf16, #tpu.memory_space<vmem>>, %arg5: memref<8x1xf32, #tpu.memory_space<vmem>>, %arg6: memref<8x72xbf16, #tpu.memory_space<vmem>>, %arg7: memref<8x1xf32, #tpu.memory_space<vmem>>, %arg8: memref<1x72xbf16, #tpu.memory_space<vmem>>, %arg9: memref<1x1xf32, #tpu.memory_space<vmem>>, %arg10: memref<1x8x256xf32, #tpu.memory_space<vmem>>) attributes {dimension_semantics = [#tpu.dimension_semantics<parallel>], iteration_bounds = array<i64: 2>, scalar_prefetch = 0 : i64, scratch_operands = 0 : i64, tpu.core_type = #tpu.core_type<tc>, window_params = [{transform_indices = @transform_0, window_bounds = array<i64: 1, 8, 256>}, {pipeline_mode = #tpu.pipeline_mode<synchronous>, transform_indices = @transform_1, window_bounds = array<i64: 16, 72>}, {pipeline_mode = #tpu.pipeline_mode<synchronous>, transform_indices = @transform_2, window_bounds = array<i64: 8, 1>}, {pipeline_mode = #tpu.pipeline_mode<synchronous>, transform_indices = @transform_3, window_bounds = array<i64: 8, 72>}, {pipeline_mode = #tpu.pipeline_mode<synchronous>, transform_indices = @transform_4, window_bounds = array<i64: 8, 1>}, {pipeline_mode = #tpu.pipeline_mode<synchronous>, transform_indices = @transform_5, window_bounds = array<i64: 8, 72>}, {pipeline_mode = #tpu.pipeline_mode<synchronous>, transform_indices = @transform_6, window_bounds = array<i64: 8, 1>}, {pipeline_mode = #tpu.pipeline_mode<synchronous>, transform_indices = @transform_7, window_bounds = array<i64: 1, 72>}, {pipeline_mode = #tpu.pipeline_mode<synchronous>, transform_indices = @transform_8, window_bounds = array<i64: 1, 1>}, {transform_indices = @transform_9, window_bounds = array<i64: 1, 8, 256>}]} {
    %0 = tpu.iota {dimensions = array<i32: 1>} : vector<1x256xi32>
    %c16_i32 = arith.constant 16 : i32
    %c0_i32 = arith.constant 0 : i32
    %1 = arith.cmpi eq, %c16_i32, %c0_i32 : i32
    %c1_i32 = arith.constant 1 : i32
    %2 = arith.select %1, %c1_i32, %c16_i32 : i32
    %3 = vector.broadcast %2 : i32 to vector<1x256xi32>
    %4 = arith.remsi %0, %3 : vector<1x256xi32>
    %c0_i32_0 = arith.constant 0 : i32
    %5 = vector.broadcast %c0_i32_0 : i32 to vector<1x256xi32>
    %6 = arith.cmpi ne, %4, %5 : vector<1x256xi32>
    %c0_i32_1 = arith.constant 0 : i32
    %7 = vector.broadcast %c0_i32_1 : i32 to vector<1x256xi32>
    %8 = arith.cmpi slt, %4, %7 : vector<1x256xi32>
    %c0_i32_2 = arith.constant 0 : i32
    %9 = arith.cmpi slt, %2, %c0_i32_2 : i32
    %10 = vector.broadcast %9 : i1 to vector<1x256xi1>
    %11 = vector.broadcast %10 : vector<1x256xi1> to vector<1x256xi1>
    %12 = arith.xori %8, %11 : vector<1x256xi1>
    %13 = arith.andi %12, %6 : vector<1x256xi1>
    %14 = vector.broadcast %2 : i32 to vector<1x256xi32>
    %15 = arith.addi %4, %14 : vector<1x256xi32>
    %16 = arith.select %13, %15, %4 : vector<1x256xi1>, vector<1x256xi32>
    %c0_i32_3 = arith.constant 0 : i32
    %17 = vector.broadcast %c0_i32_3 : i32 to vector<1x256xi32>
    %18 = arith.cmpi sgt, %16, %17 : vector<1x256xi32>
    %19 = arith.extui %18 : vector<1x256xi1> to vector<1x256xi32>
    %20 = arith.sitofp %19 : vector<1x256xi32> to vector<1x256xf32>
    %21 = arith.truncf %20 : vector<1x256xf32> to vector<1x256xbf16>
    %c15_i32 = arith.constant 15 : i32
    %22 = vector.broadcast %c15_i32 : i32 to vector<1x256xi32>
    %23 = arith.cmpi slt, %16, %22 : vector<1x256xi32>
    %24 = arith.extui %23 : vector<1x256xi1> to vector<1x256xi32>
    %25 = arith.sitofp %24 : vector<1x256xi32> to vector<1x256xf32>
    %26 = arith.truncf %25 : vector<1x256xf32> to vector<1x256xbf16>
    %c0 = arith.constant 0 : index
    %c0_4 = arith.constant 0 : index
    %c0_5 = arith.constant 0 : index
    %27 = vector.load %arg1[%c0, %c0_4, %c0_5] : memref<1x8x256xf32, #tpu.memory_space<vmem>>, vector<1x8x256xf32>
    %28 = vector.shape_cast %27 : vector<1x8x256xf32> to vector<8x256xf32>
    %29 = arith.truncf %28 : vector<8x256xf32> to vector<8x256xbf16>
    %c0_6 = arith.constant 0 : index
    %c0_7 = arith.constant 0 : index
    %30 = vector.load %arg2[%c0_6, %c0_7] : memref<16x72xbf16, #tpu.memory_space<vmem>>, vector<16x72xbf16>
    %31 = vector.shape_cast %21 : vector<1x256xbf16> to vector<1x256xbf16>
    %32 = vector.broadcast %31 : vector<1x256xbf16> to vector<8x256xbf16>
    %33 = vector.shape_cast %26 : vector<1x256xbf16> to vector<1x256xbf16>
    %34 = vector.broadcast %33 : vector<1x256xbf16> to vector<8x256xbf16>
    %cst = arith.constant 0.000000e+00 : bf16
    %35 = vector.broadcast %cst : bf16 to vector<8x128xbf16>
    %36 = tpu.concatenate %35, %29, %35 in 1 : vector<8x128xbf16>, vector<8x256xbf16>, vector<8x128xbf16> -> vector<8x512xbf16>
    %37 = vector.extract_strided_slice %36 {offsets = [0, 111], sizes = [8, 256], strides = [1, 1]} : vector<8x512xbf16> to vector<8x256xbf16>
    %38 = arith.mulf %37, %32 : vector<8x256xbf16>
    %39 = vector.extract_strided_slice %36 {offsets = [0, 112], sizes = [8, 256], strides = [1, 1]} : vector<8x512xbf16> to vector<8x256xbf16>
    %40 = vector.extract_strided_slice %36 {offsets = [0, 113], sizes = [8, 256], strides = [1, 1]} : vector<8x512xbf16> to vector<8x256xbf16>
    %41 = arith.mulf %40, %34 : vector<8x256xbf16>
    %42 = vector.extract_strided_slice %36 {offsets = [0, 127], sizes = [8, 256], strides = [1, 1]} : vector<8x512xbf16> to vector<8x256xbf16>
    %43 = arith.mulf %42, %32 : vector<8x256xbf16>
    %44 = vector.extract_strided_slice %36 {offsets = [0, 128], sizes = [8, 256], strides = [1, 1]} : vector<8x512xbf16> to vector<8x256xbf16>
    %45 = vector.extract_strided_slice %36 {offsets = [0, 129], sizes = [8, 256], strides = [1, 1]} : vector<8x512xbf16> to vector<8x256xbf16>
    %46 = arith.mulf %45, %34 : vector<8x256xbf16>
    %47 = vector.extract_strided_slice %36 {offsets = [0, 143], sizes = [8, 256], strides = [1, 1]} : vector<8x512xbf16> to vector<8x256xbf16>
    %48 = arith.mulf %47, %32 : vector<8x256xbf16>
    %49 = vector.extract_strided_slice %36 {offsets = [0, 144], sizes = [8, 256], strides = [1, 1]} : vector<8x512xbf16> to vector<8x256xbf16>
    %50 = vector.extract_strided_slice %36 {offsets = [0, 145], sizes = [8, 256], strides = [1, 1]} : vector<8x512xbf16> to vector<8x256xbf16>
    %51 = arith.mulf %50, %34 : vector<8x256xbf16>
    %52 = tpu.concatenate %38, %39, %41, %43, %44, %46, %48, %49, %51 in 0 : vector<8x256xbf16>, vector<8x256xbf16>, vector<8x256xbf16>, vector<8x256xbf16>, vector<8x256xbf16>, vector<8x256xbf16>, vector<8x256xbf16>, vector<8x256xbf16>, vector<8x256xbf16> -> vector<72x256xbf16>
    %cst_8 = arith.constant dense<0.000000e+00> : vector<16x256xf32>
    %53 = tpu.matmul %30, %52, %cst_8 {dimension_numbers = #tpu.dot_dimension_numbers<[1], [0], [0], [1], [0, 0, 1, 1], [], []>} : vector<16x72xbf16>, vector<72x256xbf16>, vector<16x256xf32> -> vector<16x256xf32>
    %54 = vector.extract_strided_slice %53 {offsets = [0, 0], sizes = [8, 256], strides = [1, 1]} : vector<16x256xf32> to vector<8x256xf32>
    %55 = vector.extract_strided_slice %53 {offsets = [8, 0], sizes = [8, 256], strides = [1, 1]} : vector<16x256xf32> to vector<8x256xf32>
    %c0_9 = arith.constant 0 : index
    %c0_10 = arith.constant 0 : index
    %56 = vector.load %arg3[%c0_9, %c0_10] : memref<8x1xf32, #tpu.memory_space<vmem>>, vector<8x1xf32>
    %57 = vector.broadcast %56 : vector<8x1xf32> to vector<8x256xf32>
    %58 = arith.addf %55, %57 : vector<8x256xf32>
    %cst_11 = arith.constant 0.000000e+00 : f32
    %59 = vector.broadcast %cst_11 : f32 to vector<8x256xf32>
    %60 = arith.maximumf %58, %59 : vector<8x256xf32>
    %61 = arith.truncf %60 : vector<8x256xf32> to vector<8x256xbf16>
    %c0_12 = arith.constant 0 : index
    %c0_13 = arith.constant 0 : index
    %62 = vector.load %arg4[%c0_12, %c0_13] : memref<8x72xbf16, #tpu.memory_space<vmem>>, vector<8x72xbf16>
    %cst_14 = arith.constant 0.000000e+00 : bf16
    %63 = vector.broadcast %cst_14 : bf16 to vector<8x128xbf16>
    %64 = tpu.concatenate %63, %61, %63 in 1 : vector<8x128xbf16>, vector<8x256xbf16>, vector<8x128xbf16> -> vector<8x512xbf16>
    %65 = vector.extract_strided_slice %64 {offsets = [0, 111], sizes = [8, 256], strides = [1, 1]} : vector<8x512xbf16> to vector<8x256xbf16>
    %66 = arith.mulf %65, %32 : vector<8x256xbf16>
    %67 = vector.extract_strided_slice %64 {offsets = [0, 112], sizes = [8, 256], strides = [1, 1]} : vector<8x512xbf16> to vector<8x256xbf16>
    %68 = vector.extract_strided_slice %64 {offsets = [0, 113], sizes = [8, 256], strides = [1, 1]} : vector<8x512xbf16> to vector<8x256xbf16>
    %69 = arith.mulf %68, %34 : vector<8x256xbf16>
    %70 = vector.extract_strided_slice %64 {offsets = [0, 127], sizes = [8, 256], strides = [1, 1]} : vector<8x512xbf16> to vector<8x256xbf16>
    %71 = arith.mulf %70, %32 : vector<8x256xbf16>
    %72 = vector.extract_strided_slice %64 {offsets = [0, 128], sizes = [8, 256], strides = [1, 1]} : vector<8x512xbf16> to vector<8x256xbf16>
    %73 = vector.extract_strided_slice %64 {offsets = [0, 129], sizes = [8, 256], strides = [1, 1]} : vector<8x512xbf16> to vector<8x256xbf16>
    %74 = arith.mulf %73, %34 : vector<8x256xbf16>
    %75 = vector.extract_strided_slice %64 {offsets = [0, 143], sizes = [8, 256], strides = [1, 1]} : vector<8x512xbf16> to vector<8x256xbf16>
    %76 = arith.mulf %75, %32 : vector<8x256xbf16>
    %77 = vector.extract_strided_slice %64 {offsets = [0, 144], sizes = [8, 256], strides = [1, 1]} : vector<8x512xbf16> to vector<8x256xbf16>
    %78 = vector.extract_strided_slice %64 {offsets = [0, 145], sizes = [8, 256], strides = [1, 1]} : vector<8x512xbf16> to vector<8x256xbf16>
    %79 = arith.mulf %78, %34 : vector<8x256xbf16>
    %80 = tpu.concatenate %66, %67, %69, %71, %72, %74, %76, %77, %79 in 0 : vector<8x256xbf16>, vector<8x256xbf16>, vector<8x256xbf16>, vector<8x256xbf16>, vector<8x256xbf16>, vector<8x256xbf16>, vector<8x256xbf16>, vector<8x256xbf16>, vector<8x256xbf16> -> vector<72x256xbf16>
    %cst_15 = arith.constant dense<0.000000e+00> : vector<8x256xf32>
    %81 = tpu.matmul %62, %80, %cst_15 {dimension_numbers = #tpu.dot_dimension_numbers<[1], [0], [0], [1], [0, 0, 1, 1], [], []>} : vector<8x72xbf16>, vector<72x256xbf16>, vector<8x256xf32> -> vector<8x256xf32>
    %c0_16 = arith.constant 0 : index
    %c0_17 = arith.constant 0 : index
    %82 = vector.load %arg5[%c0_16, %c0_17] : memref<8x1xf32, #tpu.memory_space<vmem>>, vector<8x1xf32>
    %83 = vector.broadcast %82 : vector<8x1xf32> to vector<8x256xf32>
    %84 = arith.addf %81, %83 : vector<8x256xf32>
    %cst_18 = arith.constant 0.000000e+00 : f32
    %85 = vector.broadcast %cst_18 : f32 to vector<8x256xf32>
    %86 = arith.maximumf %84, %85 : vector<8x256xf32>
    %87 = arith.truncf %86 : vector<8x256xf32> to vector<8x256xbf16>
    %c0_19 = arith.constant 0 : index
    %c0_20 = arith.constant 0 : index
    %88 = vector.load %arg6[%c0_19, %c0_20] : memref<8x72xbf16, #tpu.memory_space<vmem>>, vector<8x72xbf16>
    %cst_21 = arith.constant 0.000000e+00 : bf16
    %89 = vector.broadcast %cst_21 : bf16 to vector<8x128xbf16>
    %90 = tpu.concatenate %89, %87, %89 in 1 : vector<8x128xbf16>, vector<8x256xbf16>, vector<8x128xbf16> -> vector<8x512xbf16>
    %91 = vector.extract_strided_slice %90 {offsets = [0, 111], sizes = [8, 256], strides = [1, 1]} : vector<8x512xbf16> to vector<8x256xbf16>
    %92 = arith.mulf %91, %32 : vector<8x256xbf16>
    %93 = vector.extract_strided_slice %90 {offsets = [0, 112], sizes = [8, 256], strides = [1, 1]} : vector<8x512xbf16> to vector<8x256xbf16>
    %94 = vector.extract_strided_slice %90 {offsets = [0, 113], sizes = [8, 256], strides = [1, 1]} : vector<8x512xbf16> to vector<8x256xbf16>
    %95 = arith.mulf %94, %34 : vector<8x256xbf16>
    %96 = vector.extract_strided_slice %90 {offsets = [0, 127], sizes = [8, 256], strides = [1, 1]} : vector<8x512xbf16> to vector<8x256xbf16>
    %97 = arith.mulf %96, %32 : vector<8x256xbf16>
    %98 = vector.extract_strided_slice %90 {offsets = [0, 128], sizes = [8, 256], strides = [1, 1]} : vector<8x512xbf16> to vector<8x256xbf16>
    %99 = vector.extract_strided_slice %90 {offsets = [0, 129], sizes = [8, 256], strides = [1, 1]} : vector<8x512xbf16> to vector<8x256xbf16>
    %100 = arith.mulf %99, %34 : vector<8x256xbf16>
    %101 = vector.extract_strided_slice %90 {offsets = [0, 143], sizes = [8, 256], strides = [1, 1]} : vector<8x512xbf16> to vector<8x256xbf16>
    %102 = arith.mulf %101, %32 : vector<8x256xbf16>
    %103 = vector.extract_strided_slice %90 {offsets = [0, 144], sizes = [8, 256], strides = [1, 1]} : vector<8x512xbf16> to vector<8x256xbf16>
    %104 = vector.extract_strided_slice %90 {offsets = [0, 145], sizes = [8, 256], strides = [1, 1]} : vector<8x512xbf16> to vector<8x256xbf16>
    %105 = arith.mulf %104, %34 : vector<8x256xbf16>
    %106 = tpu.concatenate %92, %93, %95, %97, %98, %100, %102, %103, %105 in 0 : vector<8x256xbf16>, vector<8x256xbf16>, vector<8x256xbf16>, vector<8x256xbf16>, vector<8x256xbf16>, vector<8x256xbf16>, vector<8x256xbf16>, vector<8x256xbf16>, vector<8x256xbf16> -> vector<72x256xbf16>
    %cst_22 = arith.constant dense<0.000000e+00> : vector<8x256xf32>
    %107 = tpu.matmul %88, %106, %cst_22 {dimension_numbers = #tpu.dot_dimension_numbers<[1], [0], [0], [1], [0, 0, 1, 1], [], []>} : vector<8x72xbf16>, vector<72x256xbf16>, vector<8x256xf32> -> vector<8x256xf32>
    %c0_23 = arith.constant 0 : index
    %c0_24 = arith.constant 0 : index
    %108 = vector.load %arg7[%c0_23, %c0_24] : memref<8x1xf32, #tpu.memory_space<vmem>>, vector<8x1xf32>
    %109 = vector.broadcast %108 : vector<8x1xf32> to vector<8x256xf32>
    %110 = arith.addf %107, %109 : vector<8x256xf32>
    %cst_25 = arith.constant 0.000000e+00 : f32
    %111 = vector.broadcast %cst_25 : f32 to vector<8x256xf32>
    %112 = arith.maximumf %110, %111 : vector<8x256xf32>
    %113 = arith.truncf %112 : vector<8x256xf32> to vector<8x256xbf16>
    %c0_26 = arith.constant 0 : index
    %c0_27 = arith.constant 0 : index
    %114 = vector.load %arg8[%c0_26, %c0_27] : memref<1x72xbf16, #tpu.memory_space<vmem>>, vector<1x72xbf16>
    %cst_28 = arith.constant 0.000000e+00 : bf16
    %115 = vector.broadcast %cst_28 : bf16 to vector<8x128xbf16>
    %116 = tpu.concatenate %115, %113, %115 in 1 : vector<8x128xbf16>, vector<8x256xbf16>, vector<8x128xbf16> -> vector<8x512xbf16>
    %117 = vector.extract_strided_slice %116 {offsets = [0, 111], sizes = [8, 256], strides = [1, 1]} : vector<8x512xbf16> to vector<8x256xbf16>
    %118 = arith.mulf %117, %32 : vector<8x256xbf16>
    %119 = vector.extract_strided_slice %116 {offsets = [0, 112], sizes = [8, 256], strides = [1, 1]} : vector<8x512xbf16> to vector<8x256xbf16>
    %120 = vector.extract_strided_slice %116 {offsets = [0, 113], sizes = [8, 256], strides = [1, 1]} : vector<8x512xbf16> to vector<8x256xbf16>
    %121 = arith.mulf %120, %34 : vector<8x256xbf16>
    %122 = vector.extract_strided_slice %116 {offsets = [0, 127], sizes = [8, 256], strides = [1, 1]} : vector<8x512xbf16> to vector<8x256xbf16>
    %123 = arith.mulf %122, %32 : vector<8x256xbf16>
    %124 = vector.extract_strided_slice %116 {offsets = [0, 128], sizes = [8, 256], strides = [1, 1]} : vector<8x512xbf16> to vector<8x256xbf16>
    %125 = vector.extract_strided_slice %116 {offsets = [0, 129], sizes = [8, 256], strides = [1, 1]} : vector<8x512xbf16> to vector<8x256xbf16>
    %126 = arith.mulf %125, %34 : vector<8x256xbf16>
    %127 = vector.extract_strided_slice %116 {offsets = [0, 143], sizes = [8, 256], strides = [1, 1]} : vector<8x512xbf16> to vector<8x256xbf16>
    %128 = arith.mulf %127, %32 : vector<8x256xbf16>
    %129 = vector.extract_strided_slice %116 {offsets = [0, 144], sizes = [8, 256], strides = [1, 1]} : vector<8x512xbf16> to vector<8x256xbf16>
    %130 = vector.extract_strided_slice %116 {offsets = [0, 145], sizes = [8, 256], strides = [1, 1]} : vector<8x512xbf16> to vector<8x256xbf16>
    %131 = arith.mulf %130, %34 : vector<8x256xbf16>
    %132 = tpu.concatenate %118, %119, %121, %123, %124, %126, %128, %129, %131 in 0 : vector<8x256xbf16>, vector<8x256xbf16>, vector<8x256xbf16>, vector<8x256xbf16>, vector<8x256xbf16>, vector<8x256xbf16>, vector<8x256xbf16>, vector<8x256xbf16>, vector<8x256xbf16> -> vector<72x256xbf16>
    %cst_29 = arith.constant dense<0.000000e+00> : vector<1x256xf32>
    %133 = tpu.matmul %114, %132, %cst_29 {dimension_numbers = #tpu.dot_dimension_numbers<[1], [0], [0], [1], [0, 0, 1, 1], [], []>} : vector<1x72xbf16>, vector<72x256xbf16>, vector<1x256xf32> -> vector<1x256xf32>
    %c0_30 = arith.constant 0 : index
    %c0_31 = arith.constant 0 : index
    %134 = vector.load %arg9[%c0_30, %c0_31] : memref<1x1xf32, #tpu.memory_space<vmem>>, vector<1x1xf32>
    %135 = vector.broadcast %134 : vector<1x1xf32> to vector<1x256xf32>
    %136 = arith.addf %133, %135 : vector<1x256xf32>
    %137 = arith.negf %136 : vector<1x256xf32>
    %138 = math.exp %137 : vector<1x256xf32>
    %cst_32 = arith.constant 1.000000e+00 : f32
    %139 = vector.broadcast %cst_32 : f32 to vector<1x256xf32>
    %140 = arith.addf %139, %138 : vector<1x256xf32>
    %141 = arith.divf %139, %140 : vector<1x256xf32>
    %142 = vector.broadcast %141 : vector<1x256xf32> to vector<8x256xf32>
    %143 = arith.mulf %54, %142 : vector<8x256xf32>
    %144 = arith.addf %28, %143 : vector<8x256xf32>
    %145 = vector.shape_cast %144 : vector<8x256xf32> to vector<1x8x256xf32>
    %c0_33 = arith.constant 0 : index
    %c0_34 = arith.constant 0 : index
    %c0_35 = arith.constant 0 : index
    %146 = vector.load %arg10[%c0_33, %c0_34, %c0_35] : memref<1x8x256xf32, #tpu.memory_space<vmem>>, vector<1x8x256xf32>
    tpu.vector_store %arg10[%c0_33, %c0_34, %c0_35], %145 {strides = array<i32>} : memref<1x8x256xf32, #tpu.memory_space<vmem>>, vector<1x8x256xf32>,
    return
  }
  func.func @transform_0(%arg0: i32) -> (i32, i32, i32) {
    %c0_i32 = arith.constant 0 : i32
    %c0_i32_0 = arith.constant 0 : i32
    %c0_i32_1 = arith.constant 0 : i32
    return %arg0, %c0_i32, %c0_i32_0 : i32, i32, i32
  }
  func.func @transform_1(%arg0: i32) -> (i32, i32) {
    %c0_i32 = arith.constant 0 : i32
    %c0_i32_0 = arith.constant 0 : i32
    %c0_i32_1 = arith.constant 0 : i32
    return %c0_i32, %c0_i32_0 : i32, i32
  }
  func.func @transform_2(%arg0: i32) -> (i32, i32) {
    %c0_i32 = arith.constant 0 : i32
    %c0_i32_0 = arith.constant 0 : i32
    %c0_i32_1 = arith.constant 0 : i32
    return %c0_i32, %c0_i32_0 : i32, i32
  }
  func.func @transform_3(%arg0: i32) -> (i32, i32) {
    %c0_i32 = arith.constant 0 : i32
    %c0_i32_0 = arith.constant 0 : i32
    %c0_i32_1 = arith.constant 0 : i32
    return %c0_i32, %c0_i32_0 : i32, i32
  }
  func.func @transform_4(%arg0: i32) -> (i32, i32) {
    %c0_i32 = arith.constant 0 : i32
    %c0_i32_0 = arith.constant 0 : i32
    %c0_i32_1 = arith.constant 0 : i32
    return %c0_i32, %c0_i32_0 : i32, i32
  }
  func.func @transform_5(%arg0: i32) -> (i32, i32) {
    %c0_i32 = arith.constant 0 : i32
    %c0_i32_0 = arith.constant 0 : i32
    %c0_i32_1 = arith.constant 0 : i32
    return %c0_i32, %c0_i32_0 : i32, i32
  }
  func.func @transform_6(%arg0: i32) -> (i32, i32) {
    %c0_i32 = arith.constant 0 : i32
    %c0_i32_0 = arith.constant 0 : i32
    %c0_i32_1 = arith.constant 0 : i32
    return %c0_i32, %c0_i32_0 : i32, i32
  }
  func.func @transform_7(%arg0: i32) -> (i32, i32) {
    %c0_i32 = arith.constant 0 : i32
    %c0_i32_0 = arith.constant 0 : i32
    %c0_i32_1 = arith.constant 0 : i32
    return %c0_i32, %c0_i32_0 : i32, i32
  }
  func.func @transform_8(%arg0: i32) -> (i32, i32) {
    %c0_i32 = arith.constant 0 : i32
    %c0_i32_0 = arith.constant 0 : i32
    %c0_i32_1 = arith.constant 0 : i32
    return %c0_i32, %c0_i32_0 : i32, i32
  }
  func.func @transform_9(%arg0: i32) -> (i32, i32, i32) {
    %c0_i32 = arith.constant 0 : i32
    %c0_i32_0 = arith.constant 0 : i32
    %c0_i32_1 = arith.constant 0 : i32
    return %arg0, %c0_i32, %c0_i32_0 : i32, i32, i32
  }
}

</mosaic_0001>

<bundles_post_ra>
// kernel: sa_adapt_forward.1
= control target key start
LH: loop header
LB: loop body
LE: loop exit
PB: predicated region body
PF: predicated region fallthrough
CT: control target
= control target key end

     0   :  { %s1640_s11 = smov 0   ;;  %s2164_s0 = inlined_call_operand.vmem [shape: f32[2,8,256], index: 0, kind: input, shape index: {}]   ;;  %s2165_s1 = inlined_call_operand.vmem [shape: bf16[16,72], index: 1, kind: input, shape index: {}]   ;;  %s2166_s2 = inlined_call_operand.vmem [shape: f32[8,1], index: 2, kind: input, shape index: {}]   ;;  %s2167_s3 = inlined_call_operand.vmem [shape: bf16[8,72], index: 3, kind: input, shape index: {}]   ;;  %s2168_s4 = inlined_call_operand.vmem [shape: f32[8,1], index: 4, kind: input, shape index: {}]   ;;  %s2169_s5 = inlined_call_operand.vmem [shape: bf16[8,72], index: 5, kind: input, shape index: {}]   ;;  %s2170_s6 = inlined_call_operand.vmem [shape: f32[8,1], index: 6, kind: input, shape index: {}]   ;;  %s2171_s7 = inlined_call_operand.vmem [shape: bf16[1,72], index: 7, kind: input, shape index: {}]   ;;  %s2172_s8 = inlined_call_operand.<no memory space> [shape: f32[1,1], index: 8, kind: input, shape index: {}]   ;;  %s2173_s9 = inlined_call_operand.vmem [shape: f32[2,8,256], index: 9, kind: output, shape index: {}]  }
   0x1   :  { %v14_v0 = vstv %s2172_s8 }
   0x2   :  { %15 = vst [vmem:[#allocation2] sm:$0x1] %v14_v0 }
   0x3 LB: > { %s1502_s12 = sadd.s32 4294967295, %s1571_s11   ;;  %p1506_p0 = scmp.ge.s32.totalorder %s1571_s11, 1  ;;  %s1571_s11 = sphi %s1640_s11, %s21_s11  }
   0x4   : > { %p289_p1 = scmp.lt.s32.totalorder %s1571_s11, 3 }
   0x6   : > { %p290_p2 = pnand %p1506_p0, %p289_p1 }
   0x7   : > { %v336_v1 = vlaneseq (!%p290_p2)  ;;  %v1573_v2 = vmov (!%p290_p2), 0   ;;  %v1574_v7 = vmov (!%p290_p2), 0.0   ;;  %p325_p3 = scmp.lt.s32.totalorder (!%p290_p2), %s1502_s12, 1  ;;  %s1575_s8 = smov (!%p290_p2), 113   ;;  %vm405_vm4 = vcmask (!%p290_p2), 924672  }
   0x8   : > { %293 = sbr.rel (%p290_p2) target bundleno = 2181 (0x885), region = 56  ;;  %699 = vmatprep.mubr.bf16.mxu0 (!%p290_p2), %v1573_v2  ;;  %1552 = vset.pattern.permute.xlu0 (!%p290_p2), %v1573_v2  ;;  %s1576_s13 = smov (!%p290_p2), 127   ;;  %v1686_v22 = vrot.slane (!%p290_p2), %v1573_v2, 4  ;;  %vm441_vm5 = vcmask (!%p290_p2), 121856   ;;  %vm417_vm6 = vcmask (!%p290_p2), 1039360   ;;  %vm429_vm7 = vcmask (!%p290_p2), 7168  }
   0x9   : > { %v337_v3 = vand.u32 (!%p290_p2), 127, %v336_v1  ;;  %942 = vmatprep.mubr.bf16.mxu1 (!%p290_p2), %v1573_v2  ;;  %1553 = vset.pattern.permute.xlu1 (!%p290_p2), %v1573_v2  ;;  %s1577_s15 = smov (!%p290_p2), 1   ;;  %s1578_s19 = smov (!%p290_p2), 15   ;;  %vm453_vm8 = vcmask (!%p290_p2), 138240   ;;  %vm391_vm9 = vcmask (!%p290_p2), 908288   ;;  %vm555_vm10 = vcmask (!%p290_p2), 1043456  }
   0xa   : > { %s1579_s20 = smov (!%p290_p2), 17   ;;  %s1580_s21 = smov (!%p290_p2), 111   ;;  %vm531_vm11 = vcmask (!%p290_p2), 785408   ;;  %vm540_vm12 = vcmask (!%p290_p2), 777216   ;;  %vm519_vm13 = vcmask (!%p290_p2), 900096   ;;  %vm499_vm14 = vcmask (!%p290_p2), 916480  }
   0xb   : > { %v343_v4 = vand.u32 (!%p290_p2), 15, %v337_v3  ;;  %v338_v5 = vadd.s32 (!%p290_p2), 128, %v337_v3  ;;  %s1581_s22 = smov (!%p290_p2), 126   ;;  %s1582_s23 = smov (!%p290_p2), 110   ;;  %vm484_vm15 = vcmask (!%p290_p2), 1031168  }
   0xc   : > { %s1583_s24 = smov (!%p290_p2), 96   ;;  %s1584_s25 = smov (!%p290_p2), 112  }
   0xd   : > { %vm371_vm0 = vcmp.lt.s32.totalorder (!%p290_p2), %v343_v4, 15  ;;  %vm363_vm1 = vcmp.gt.s32.totalorder (!%p290_p2), %v343_v4, 0  ;;  %v350_v6 = vand.u32 (!%p290_p2), 15, %v338_v5  ;;  %s1585_s26 = smov (!%p290_p2), 95   ;;  %s1586_s27 = smov (!%p290_p2), 94  }
   0xe   : > { %v1513_v8 = vsel (!%p290_p2), %vm371_vm0, 1.0, %v1574_v7  ;;  %v1511_v9 = vsel (!%p290_p2), %vm363_vm1, 1.0, %v1574_v7  ;;  %vm552_vm0 = vcmask (!%p290_p2), 769024   ;;  %vm657_vm1 = vcmask (!%p290_p2), 588800  }
   0xf   : > { %v377_v10 = vpack.c.bf16 %v1513_v8, %v1513_v8  ;;  %v369_v11 = vpack.c.bf16 %v1511_v9, %v1511_v9  ;;  %vm372_vm2 = vcmp.lt.s32.totalorder %v350_v6, 15  ;;  %vm364_vm3 = vcmp.gt.s32.totalorder %v350_v6, 0  ;;  %s2175_s12 = smov (!%p325_p3, %s1502_s12), 1 }
  0x10   : > { %v1514_v12 = vsel %vm372_vm2, 1.0, %v1574_v7  ;;  %v1512_v13 = vsel %vm364_vm3, 1.0, %v1574_v7  ;;  %s1528_s14 = sshll.u32 %s2175_s12, 4 }
  0x11   : > { %401 = vrot.lane.b32.xlu1 %v377_v10, %s1575_s8  ;;  %413 = vrot.lane.b32.xlu0 %v369_v11, %s1576_s13  ;;  %v378_v14 = vpack.c.bf16 %v1514_v12, %v1514_v12  ;;  %v370_v15 = vpack.c.bf16 %v1512_v13, %v1512_v13  ;;  %s1667_s18 = scalar_lea.vmem %s2164_s0, %s1528_s14 }
  0x12   : > { %v380_v16 = vld [vmem:[%s1667_s18 + $0x8] sm:$0xff]  ;;  %v379_v17 = vld [vmem:[%s1667_s18] sm:$0xff] }
  0x13   : > { %v1673_v18 = vpack.c.bf16 %v380_v16, %v380_v16  ;;  %v1675_v19 = vpack.c.bf16 %v379_v17, %v379_v17 }
  0x15   : > { %403 = vrot.lane.b32.xlu1 %v378_v14, %s1575_s8  ;;  %415 = vrot.lane.b32.xlu0 %v370_v15, %s1576_s13  ;;  %v466_v20 = vrot.slane %v1673_v18, 4  ;;  %v465_v21 = vrot.slane %v1675_v19, 4 }
  0x19   : > { %427 = vrot.lane.b32.xlu1 %v378_v14, %s1577_s15  ;;  %425 = vrot.lane.b32.xlu0 %v377_v10, %s1577_s15 }
  0x1d   : > { %439 = vrot.lane.b32.xlu1 %v370_v15, %s1578_s19  ;;  %437 = vrot.lane.b32.xlu0 %v369_v11, %s1578_s19 }
  0x21   : > { %449 = vrot.lane.b32.xlu0 %v377_v10, %s1579_s20  ;;  %451 = vrot.lane.b32.xlu1 %v378_v14, %s1579_s20 }
  0x25   : > { %389 = vrot.lane.b32.xlu1 %v370_v15, %s1580_s21  ;;  %387 = vrot.lane.b32.xlu0 %v369_v11, %s1580_s21 }
  0x29   : > { %471 = vrot.lane.b32.xlu1 %v466_v20, %s1576_s13  ;;  %469 = vrot.lane.b32.xlu0 %v465_v21, %s1576_s13 }
  0x2d   : > { %467 = vrot.lane.b32.xlu0 %v1686_v22, %s1576_s13  ;;  %502 = vrot.lane.b32.xlu1 %v1675_v19, %s1580_s21 }
  0x31   : > { %504 = vrot.lane.b32.xlu0 %v1673_v18, %s1580_s21 }
  0x83   : > { %v402_v23 = vpop.permute.xlu1 %401  ;;  %v414_v24 = vpop.permute.xlu0 %413 }
  0x84   : > { %v410_v25 = vmul.bf16 0, %v402_v23  ;;  %v422_v39 = vmul.bf16 0, %v414_v24 }
  0x86   : > { %478 = vrot.lane.b32.xlu1 %v410_v25, %s1581_s22  ;;  %v490_v43 = vrot.slane %v422_v39, 4 }
  0x87   : > { %v1695_v26 = vpop.permute.xlu1 %403  ;;  %v1697_v27 = vpop.permute.xlu0 %415 }
  0x88   : > { %v1706_v33 = vsel %vm405_vm4, %v402_v23, %v1695_v26  ;;  %v412_v37 = vmul.bf16 %v1695_v26, %v1673_v18  ;;  %v1725_v42 = vsel %vm417_vm6, %v414_v24, %v1697_v27  ;;  %v424_v48 = vmul.bf16 %v1697_v27, %v1673_v18 }
  0x89   : > { %v411_v36 = vmul.bf16 %v1706_v33, %v1675_v19  ;;  %v423_v46 = vmul.bf16 %v1725_v42, %v1675_v19 }
  0x8a   : > { %v492_v53 = vrot.slane %v424_v48, 4 }
  0x8b   : > { %v428_v28 = vpop.permute.xlu1 %427  ;;  %v1699_v29 = vpop.permute.xlu0 %425  ;;  %v491_v51 = vrot.slane %v423_v46, 4 }
  0x8c   : > { %v434_v30 = vmul.bf16 %v1699_v29, %v1675_v19  ;;  %v436_v40 = vmul.bf16 0, %v428_v28  ;;  %v1737_v49 = vsel %vm429_vm7, %v1699_v29, %v428_v28 }
  0x8d   : > { %v435_v54 = vmul.bf16 %v1737_v49, %v1673_v18 }
  0x8e   : > { %v510_v31 = vrot.slane %v434_v30, 4  ;;  %v512_v44 = vrot.slane %v436_v40, 4 }
  0x8f   : > { %v1703_v32 = vpop.permute.xlu0 %437  ;;  %v440_v34 = vpop.permute.xlu1 %439  ;;  %v511_v56 = vrot.slane %v435_v54, 4 }
  0x90   : > { %513 = vrot.lane.b32.xlu1 %v510_v31, %s1582_s23  ;;  %v446_v35 = vmul.bf16 %v1703_v32, %v1675_v19  ;;  %v1717_v38 = vsel %vm441_vm5, %v1703_v32, %v440_v34  ;;  %v448_v45 = vmul.bf16 0, %v440_v34 }
  0x91   : > { %v447_v41 = vmul.bf16 %v1717_v38, %v1673_v18 }
  0x92   : > { %525 = vrot.lane.b32.xlu0 %v446_v35, %s1583_s24 }
  0x93   : > { %v1731_v47 = vpop.permute.xlu0 %449  ;;  %v452_v50 = vpop.permute.xlu1 %451 }
  0x94   : > { %480 = vrot.lane.b32.xlu1 %v411_v36, %s1581_s22  ;;  %v1749_v57 = vsel %vm453_vm8, %v1731_v47, %v452_v50  ;;  %v458_v63 = vmul.bf16 %v1731_v47, %v1675_v19  ;;  %v460_v6 = vmul.bf16 0, %v452_v50 }
  0x95   : > { %v459_v61 = vmul.bf16 %v1749_v57, %v1673_v18 }
  0x96   : > { %482 = vrot.lane.b32.xlu0 %v412_v37, %s1581_s22 }
  0x97   : > { %v388_v52 = vpop.permute.xlu0 %387  ;;  %v1743_v55 = vpop.permute.xlu1 %389 }
  0x98   : > { %527 = vrot.lane.b32.xlu1 %v447_v41, %s1583_s24  ;;  %v1754_v59 = vsel %vm391_vm9, %v388_v52, %v1743_v55  ;;  %v1771_v4 = vmul.bf16 0, %v388_v52  ;;  %v398_v8 = vmul.bf16 %v1743_v55, %v1673_v18 }
  0x99   : > { %v397_v62 = vmul.bf16 %v1754_v59, %v1675_v19 }
  0x9a   : > { %493 = vrot.lane.b32.xlu0 %v490_v43, %s1584_s25 }
  0x9b   : > { %v470_v58 = vpop.permute.xlu0 %469  ;;  %v472_v60 = vpop.permute.xlu1 %471 }
  0x9c   : > { %517 = vrot.lane.b32.xlu1 %v512_v44, %s1582_s23  ;;  %v474_v0 = vsel %vm417_vm6, %v470_v58, %v472_v60  ;;  %v564_v10 = vsel %vm555_vm10, %v398_v8, %v472_v60 }
  0x9d   : > { %v561_v5 = vsel %vm555_vm10, %v397_v62, %v474_v0 }
  0x9e   : > { %529 = vrot.lane.b32.xlu0 %v448_v45, %s1583_s24 }
  0x9f   : > { %v1768_v3 = vpop.permute.xlu0 %467  ;;  %v503_v11 = vpop.permute.xlu1 %502 }
  0xa0   : > { %495 = vrot.lane.b32.xlu1 %v491_v51, %s1584_s25  ;;  %v473_v7 = vsel %vm417_vm6, %v1768_v3, %v470_v58 }
  0xa1   : > { %v558_v9 = vsel %vm555_vm10, %v1771_v4, %v473_v7 }
  0xa2   : > { %497 = vrot.lane.b32.xlu0 %v492_v53, %s1584_s25 }
  0xa3   : > { %v505_v13 = vpop.permute.xlu0 %504 }
  0xa4   : > { %534 = vrot.lane.b32.xlu1 %v465_v21, %s1585_s26  ;;  %v506_v48 = vsel %vm391_vm9, %v503_v11, %v505_v13 }
  0xa6   : > { %515 = vrot.lane.b32.xlu0 %v511_v56, %s1582_s23 }
  0xa8   : > { %538 = vrot.lane.b32.xlu1 %v1686_v22, %s1585_s26 }
  0xaa   : > { %536 = vrot.lane.b32.xlu0 %v466_v20, %s1585_s26 }
  0xac   : > { %548 = vrot.lane.b32.xlu1 %v459_v61, %s1586_s27 }
  0xae   : > { %546 = vrot.lane.b32.xlu0 %v458_v63, %s1586_s27 }
  0xb0   : > { %611 = vrot.lane.b32.xlu1 %v561_v5, %s1579_s20 }
  0xb2   : > { %550 = vrot.lane.b32.xlu0 %v460_v6, %s1586_s27 }
  0xb4   : > { %609 = vrot.lane.b32.xlu1 %v558_v9, %s1579_s20 }
  0xb6   : > { %613 = vrot.lane.b32.xlu0 %v564_v10, %s1579_s20  ;;  %v710_v10 = vld [vmem:[%s2166_s2] sm:$0xff] }
  0xf8   : > { %v1786_v12 = vpop.permute.xlu1 %478 }
 0x102   : > { %v514_v14 = vpop.permute.xlu1 %513 }
 0x103   : > { %v576_v15 = vsel %vm555_vm10, %v503_v11, %v514_v14 }
 0x104   : > { %v526_v16 = vpop.permute.xlu0 %525  ;;  %621 = vrot.lane.b32.xlu1 %v576_v15, %s1579_s20 }
 0x106   : > { %v481_v17 = vpop.permute.xlu1 %480 }
 0x107   : > { %v485_v58 = vsel %vm484_vm15, %v1786_v12, %v481_v17 }
 0x108   : > { %v483_v18 = vpop.permute.xlu0 %482 }
 0x109   : > { %v486_v50 = vsel %vm484_vm15, %v481_v17, %v483_v18 }
 0x10a   : > { %v528_v19 = vpop.permute.xlu1 %527 }
 0x10b   : > { %v532_v35 = vsel %vm531_vm11, %v526_v16, %v528_v19 }
 0x10c   : > { %v1790_v20 = vpop.permute.xlu0 %493 }
 0x10e   : > { %v1792_v21 = vpop.permute.xlu1 %517 }
 0x110   : > { %v1794_v22 = vpop.permute.xlu0 %529 }
 0x111   : > { %v533_v37 = vsel %vm531_vm11, %v528_v19, %v1794_v22 }
 0x112   : > { %v496_v23 = vpop.permute.xlu1 %495 }
 0x113   : > { %v500_v54 = vsel %vm499_vm14, %v1790_v20, %v496_v23 }
 0x114   : > { %v498_v24 = vpop.permute.xlu0 %497  ;;  %v567_v60 = vsel %vm555_vm10, %v485_v58, %v500_v54 }
 0x115   : > { %v573_v25 = vsel %vm555_vm10, %v483_v18, %v498_v24  ;;  %v501_v44 = vsel %vm499_vm14, %v496_v23, %v498_v24 }
 0x116   : > { %v535_v28 = vpop.permute.xlu1 %534  ;;  %619 = vrot.lane.b32.xlu1 %v573_v25, %s1579_s20  ;;  %v570_v51 = vsel %vm555_vm10, %v486_v50, %v501_v44  ;;  %v1554_v44 = vld [vmem:[%s2165_s1] sm:$0xff]  }
 0x117   : > { %v585_v8 = vsel %vm555_vm10, %v526_v16, %v535_v28 }
 0x118   : > { %v516_v30 = vpop.permute.xlu0 %515 }
 0x119   : > { %v520_v45 = vsel %vm519_vm13, %v514_v14, %v516_v30  ;;  %v521_v62 = vsel %vm519_vm13, %v516_v30, %v1792_v21 }
 0x11a   : > { %v1798_v31 = vpop.permute.xlu1 %538  ;;  %v579_v52 = vsel %vm555_vm10, %v506_v48, %v520_v45  ;;  %v582_v7 = vsel %vm555_vm10, %v505_v13, %v521_v62 }
 0x11c   : > { %v537_v34 = vpop.permute.xlu0 %536 }
 0x11d   : > { %v541_v36 = vsel %vm540_vm12, %v535_v28, %v537_v34  ;;  %v542_v39 = vsel %vm540_vm12, %v537_v34, %v1798_v31 }
 0x11e   : > { %v588_v40 = vsel %vm555_vm10, %v532_v35, %v541_v36  ;;  %v591_v41 = vsel %vm555_vm10, %v533_v37, %v542_v39  ;;  %v549_v43 = vpop.permute.xlu1 %548 }
 0x11f   : > { %629 = vrot.lane.b32.xlu0 %v588_v40, %s1579_s20  ;;  %631 = vrot.lane.b32.xlu1 %v591_v41, %s1579_s20 }
 0x120   : > { %v547_v46 = vpop.permute.xlu0 %546 }
 0x121   : > { %v553_v9 = vsel %vm552_vm0, %v547_v46, %v549_v43 }
 0x122   : > { %v612_v53 = vpop.permute.xlu1 %611 }
 0x123   : > { %617 = vrot.lane.b32.xlu0 %v570_v51, %s1579_s20  ;;  %623 = vrot.lane.b32.xlu1 %v579_v52, %s1579_s20 }
 0x124   : > { %v1820_v56 = vpop.permute.xlu0 %550 }
 0x125   : > { %v554_v63 = vsel %vm552_vm0, %v549_v43, %v1820_v56 }
 0x126   : > { %v610_v61 = vpop.permute.xlu1 %609 }
 0x127   : > { %615 = vrot.lane.b32.xlu0 %v567_v60, %s1579_s20  ;;  %633 = vrot.lane.b32.xlu1 %v547_v46, %s1579_s20  ;;  %v639_v6 = vsel %vm453_vm8, %v610_v61, %v612_v53 }
 0x128   : > { %v614_v0 = vpop.permute.xlu0 %613 }
 0x129   : > { %v640_v5 = vsel %vm453_vm8, %v612_v53, %v614_v0 }
 0x12a   : > { %667 = vmatprep.subr.bf16.mxu0 %v640_v5 }
 0x12b   : > { %625 = vrot.lane.b32.xlu0 %v582_v7, %s1579_s20  ;;  %637 = vrot.lane.b32.xlu1 %v554_v63, %s1579_s20 }
 0x12c   : > { %668 = vmatpush1.bf16.msra.mxu0 %v639_v6 }
 0x12f   : > { %627 = vrot.lane.b32.xlu0 %v585_v8, %s1579_s20 }
 0x133   : > { %635 = vrot.lane.b32.xlu0 %v553_v9, %s1579_s20 }
 0x137   : > { %713 = vperm.xlu0 %1552, %v710_v10  }
 0x176   : > { %v622_v11 = vpop.permute.xlu1 %621 }
 0x188   : > { %v620_v13 = vpop.permute.xlu1 %619 }
 0x191   : > { %v630_v14 = vpop.permute.xlu0 %629  ;;  %v632_v15 = vpop.permute.xlu1 %631 }
 0x192   : > { %v646_v34 = vsel %vm453_vm8, %v630_v14, %v632_v15 }
 0x195   : > { %v618_v17 = vpop.permute.xlu0 %617  ;;  %v624_v23 = vpop.permute.xlu1 %623 }
 0x196   : > { %v642_v18 = vsel %vm453_vm8, %v618_v17, %v620_v13  ;;  %v643_v30 = vsel %vm453_vm8, %v622_v11, %v624_v23 }
 0x197   : > { %669 = vmatprep.subr.bf16.mxu0 %v642_v18 }
 0x199   : > { %v616_v16 = vpop.permute.xlu0 %615  ;;  %v634_v28 = vpop.permute.xlu1 %633 }
 0x19a   : > { %v641_v19 = vsel %vm453_vm8, %v616_v16, %v618_v17 }
 0x19b   : > { %670 = vmatpush1.bf16.msra.mxu0 %v641_v19 }
 0x19d   : > { %v626_v24 = vpop.permute.xlu0 %625  ;;  %v638_v37 = vpop.permute.xlu1 %637 }
 0x19e   : > { %v644_v25 = vsel %vm453_vm8, %v624_v23, %v626_v24 }
 0x19f   : > { %671 = vmatprep.subr.bf16.mxu0 %v644_v25 }
 0x1a0   : > { %672 = vmatpush1.bf16.msra.mxu0 %v643_v30 }
 0x1a1   : > { %v628_v35 = vpop.permute.xlu0 %627  ;;  %673 = vmatprep.subr.bf16.mxu0 %v646_v34 }
 0x1a2   : > { %v645_v36 = vsel %vm453_vm8, %v628_v35, %v630_v14 }
 0x1a4   : > { %674 = vmatpush1.bf16.msra.mxu0 %v645_v36 }
 0x1a5   : > { %v636_v39 = vpop.permute.xlu0 %635 }
 0x1a6   : > { %v647_v40 = vsel %vm453_vm8, %v634_v28, %v636_v39  ;;  %v648_v41 = vsel %vm453_vm8, %v636_v39, %v638_v37 }
 0x1a7   : > { %1516 = vmatprep.subr.msk.bf16.mxu0 %vm555_vm10, %v648_v41  ;;  %v662_v43 = vsel %vm555_vm10, %v647_v40, 0 }
 0x1a8   : > { %676 = vmatpush1.bf16.msra.mxu0 %v662_v43 }
 0x1ab   : > { %1517 = vmatmul.mubr.msk.bf16.vlgmr.msra.gmra.mrb[0].mxu0 %vm657_vm1, %v1554_v44 }
 0x1ac   : > { %1175 = vmatprep.mubr.bf16.mxu0 %v1573_v2 }
 0x1b6   : > { %v714_v46 = vpop.permute.xlu0 %713 }
 0x27e   : > { %v1858_v45 = vpop.f32.mrb[0].mxu0 }
 0x27f   : > { %v1860_v48 = vpop.f32.mrb[1].mxu0 }
 0x280   : > { %v705_v50 = vpop.f32.mrb[2].mxu0 }
 0x281   : > { %v716_v51 = vadd.f32 %v714_v46, %v705_v50  ;;  %v707_v52 = vpop.f32.mrb[3].mxu0 }
 0x282   : > { %v717_v53 = vadd.f32 %v714_v46, %v707_v52 }
 0x283   : > { %v718_v54 = vmax.f32 %v716_v51, 0.0 }
 0x284   : > { %v719_v58 = vmax.f32 %v717_v53, 0.0 }
 0x285   : > { %v720_v60 = vpack.c.bf16 %v718_v54, %v718_v54 }
 0x286   : > { %v721_v61 = vpack.c.bf16 %v719_v58, %v719_v58 }
 0x287   : > { %763 = vrot.lane.b32.xlu0 %v720_v60, %s1580_s21  ;;  %v725_v62 = vmul.bf16 %v720_v60, %v1706_v33  ;;  %v737_v63 = vrot.slane %v720_v60, 4  ;;  %v731_v0 = vmul.bf16 %v720_v60, %v1703_v32  ;;  %v727_v5 = vmul.bf16 %v720_v60, %v1725_v42 }
 0x288   : > { %765 = vrot.lane.b32.xlu1 %v721_v61, %s1580_s21  ;;  %v738_v6 = vrot.slane %v721_v61, 4  ;;  %v729_v8 = vmul.bf16 %v720_v60, %v1699_v29  ;;  %v726_v9 = vmul.bf16 %v721_v61, %v1695_v26  ;;  %v732_v11 = vmul.bf16 %v721_v61, %v1717_v38 }
 0x289   : > { %v755_v7 = vrot.slane %v727_v5, 4  ;;  %v728_v13 = vmul.bf16 %v721_v61, %v1697_v27  ;;  %v730_v15 = vmul.bf16 %v721_v61, %v1737_v49  ;;  %v733_v17 = vmul.bf16 %v720_v60, %v1731_v47 }
 0x28a   : > { %v770_v10 = vrot.slane %v729_v8, 4  ;;  %v734_v16 = vmul.bf16 %v721_v61, %v1749_v57  ;;  %v724_v35 = vmul.bf16 %v721_v61, %v1743_v55  ;;  %v723_v37 = vmul.bf16 %v720_v60, %v1754_v59 }
 0x28b   : > { %747 = vrot.lane.b32.xlu0 %v725_v62, %s1581_s22  ;;  %v756_v14 = vrot.slane %v728_v13, 4  ;;  %v771_v18 = vrot.slane %v730_v15, 4 }
 0x28c   : > { %739 = vrot.lane.b32.xlu1 %v737_v63, %s1576_s13 }
 0x28f   : > { %780 = vrot.lane.b32.xlu0 %v731_v0, %s1583_s24 }
 0x290   : > { %741 = vrot.lane.b32.xlu1 %v738_v6, %s1576_s13 }
 0x293   : > { %757 = vrot.lane.b32.xlu0 %v755_v7, %s1584_s25 }
 0x294   : > { %749 = vrot.lane.b32.xlu1 %v726_v9, %s1581_s22 }
 0x297   : > { %772 = vrot.lane.b32.xlu0 %v770_v10, %s1582_s23 }
 0x298   : > { %782 = vrot.lane.b32.xlu1 %v732_v11, %s1583_s24 }
 0x29b   : > { %786 = vrot.lane.b32.xlu0 %v737_v63, %s1585_s26 }
 0x29c   : > { %759 = vrot.lane.b32.xlu1 %v756_v14, %s1584_s25 }
 0x29f   : > { %794 = vrot.lane.b32.xlu0 %v733_v17, %s1586_s27 }
 0x2a0   : > { %774 = vrot.lane.b32.xlu1 %v771_v18, %s1582_s23 }
 0x2a4   : > { %788 = vrot.lane.b32.xlu1 %v738_v6, %s1585_s26 }
 0x2a8   : > { %796 = vrot.lane.b32.xlu1 %v734_v16, %s1586_s27 }
 0x2f9   : > { %v764_v19 = vpop.permute.xlu0 %763 }
 0x2fa   : > { %v766_v23 = vpop.permute.xlu1 %765 }
 0x2fb   : > { %v767_v13 = vsel %vm391_vm9, %v764_v19, %v766_v23 }
 0x2fd   : > { %v748_v24 = vpop.permute.xlu0 %747 }
 0x2fe   : > { %v740_v25 = vpop.permute.xlu1 %739  ;;  %v751_v7 = vsel %vm484_vm15, %v1786_v12, %v748_v24 }
 0x2ff   : > { %v743_v28 = vsel %vm417_vm6, %v1768_v3, %v740_v25 }
 0x300   : > { %v801_v30 = vsel %vm555_vm10, %v1771_v4, %v743_v28 }
 0x301   : > { %v781_v34 = vpop.permute.xlu0 %780  ;;  %853 = vrot.lane.b32.xlu0 %v801_v30, %s1579_s20 }
 0x302   : > { %v742_v36 = vpop.permute.xlu1 %741 }
 0x303   : > { %v744_v39 = vsel %vm417_vm6, %v740_v25, %v742_v36  ;;  %v807_v40 = vsel %vm555_vm10, %v724_v35, %v742_v36 }
 0x304   : > { %857 = vrot.lane.b32.xlu1 %v807_v40, %s1579_s20  ;;  %v804_v41 = vsel %vm555_vm10, %v723_v37, %v744_v39 }
 0x305   : > { %v758_v43 = vpop.permute.xlu0 %757  ;;  %855 = vrot.lane.b32.xlu0 %v804_v41, %s1579_s20 }
 0x306   : > { %v750_v44 = vpop.permute.xlu1 %749  ;;  %v761_v6 = vsel %vm499_vm14, %v1790_v20, %v758_v43 }
 0x307   : > { %v810_v9 = vsel %vm555_vm10, %v751_v7, %v761_v6  ;;  %v752_v14 = vsel %vm484_vm15, %v748_v24, %v750_v44 }
 0x309   : > { %v773_v46 = vpop.permute.xlu0 %772 }
 0x30a   : > { %v783_v50 = vpop.permute.xlu1 %782  ;;  %v819_v51 = vsel %vm555_vm10, %v764_v19, %v773_v46 }
 0x30b   : > { %865 = vrot.lane.b32.xlu0 %v819_v51, %s1579_s20  ;;  %v784_v60 = vsel %vm531_vm11, %v781_v34, %v783_v50  ;;  %v785_v61 = vsel %vm531_vm11, %v783_v50, %v1794_v22 }
 0x30d   : > { %v787_v54 = vpop.permute.xlu0 %786 }
 0x30e   : > { %v760_v52 = vpop.permute.xlu1 %759  ;;  %v828_v24 = vsel %vm555_vm10, %v781_v34, %v787_v54 }
 0x30f   : > { %v816_v8 = vsel %vm555_vm10, %v750_v44, %v760_v52  ;;  %v762_v10 = vsel %vm499_vm14, %v758_v43, %v760_v52 }
 0x310   : > { %v813_v17 = vsel %vm555_vm10, %v752_v14, %v762_v10  ;;  %v722_v10 = vld [vmem:[%s2167_s3] sm:$0xf] }
 0x311   : > { %v795_v16 = vpop.permute.xlu0 %794 }
 0x312   : > { %v775_v53 = vpop.permute.xlu1 %774 }
 0x313   : > { %v776_v11 = vsel %vm519_vm13, %v773_v46, %v775_v53  ;;  %v777_v18 = vsel %vm519_vm13, %v775_v53, %v1792_v21 }
 0x314   : > { %v822_v15 = vsel %vm555_vm10, %v767_v13, %v776_v11  ;;  %v825_v25 = vsel %vm555_vm10, %v766_v23, %v777_v18  ;;  %v835_v23 = vld [vmem:[%s2168_s4] sm:$0xff] }
 0x316   : > { %v789_v58 = vpop.permute.xlu1 %788 }
 0x317   : > { %v790_v62 = vsel %vm540_vm12, %v787_v54, %v789_v58  ;;  %v791_v63 = vsel %vm540_vm12, %v789_v58, %v1798_v31 }
 0x318   : > { %v834_v0 = vsel %vm555_vm10, %v785_v61, %v791_v63  ;;  %v831_v5 = vsel %vm555_vm10, %v784_v60, %v790_v62 }
 0x319   : > { %875 = vrot.lane.b32.xlu0 %v834_v0, %s1579_s20  ;;  %873 = vrot.lane.b32.xlu1 %v831_v5, %s1579_s20 }
 0x31a   : > { %v797_v28 = vpop.permute.xlu1 %796 }
 0x31b   : > { %v799_v19 = vsel %vm552_vm0, %v797_v28, %v1820_v56  ;;  %v798_v30 = vsel %vm552_vm0, %v795_v16, %v797_v28 }
 0x31d   : > { %863 = vrot.lane.b32.xlu0 %v816_v8, %s1579_s20  ;;  %859 = vrot.lane.b32.xlu1 %v810_v9, %s1579_s20 }
 0x321   : > { %867 = vrot.lane.b32.xlu0 %v822_v15, %s1579_s20  ;;  %861 = vrot.lane.b32.xlu1 %v813_v17, %s1579_s20 }
 0x325   : > { %877 = vrot.lane.b32.xlu0 %v795_v16, %s1579_s20  ;;  %869 = vrot.lane.b32.xlu1 %v825_v25, %s1579_s20 }
 0x329   : > { %881 = vrot.lane.b32.xlu0 %v799_v19, %s1579_s20  ;;  %871 = vrot.lane.b32.xlu1 %v828_v24, %s1579_s20 }
 0x32d   : > { %879 = vrot.lane.b32.xlu1 %v798_v30, %s1579_s20 }
 0x331   : > { %838 = vperm.xlu1 %1553, %v835_v23  }
 0x373   : > { %v854_v35 = vpop.permute.xlu0 %853 }
 0x376   : > { %v858_v36 = vpop.permute.xlu1 %857 }
 0x377   : > { %v856_v37 = vpop.permute.xlu0 %855 }
 0x378   : > { %v884_v39 = vsel %vm453_vm8, %v856_v37, %v858_v36  ;;  %v883_v34 = vsel %vm453_vm8, %v854_v35, %v856_v37 }
 0x379   : > { %910 = vmatprep.subr.bf16.mxu1 %v884_v39 }
 0x37a   : > { %911 = vmatpush1.bf16.msra.mxu1 %v883_v34 }
 0x37d   : > { %v866_v40 = vpop.permute.xlu0 %865 }
 0x38b   : > { %v876_v41 = vpop.permute.xlu0 %875  ;;  %v874_v43 = vpop.permute.xlu1 %873 }
 0x38c   : > { %v890_v62 = vsel %vm453_vm8, %v874_v43, %v876_v41 }
 0x38f   : > { %v864_v44 = vpop.permute.xlu0 %863  ;;  %v860_v46 = vpop.permute.xlu1 %859 }
 0x393   : > { %v868_v50 = vpop.permute.xlu0 %867  ;;  %v862_v51 = vpop.permute.xlu1 %861 }
 0x394   : > { %v886_v52 = vsel %vm453_vm8, %v862_v51, %v864_v44  ;;  %v885_v53 = vsel %vm453_vm8, %v860_v46, %v862_v51  ;;  %v887_v61 = vsel %vm453_vm8, %v866_v40, %v868_v50 }
 0x395   : > { %912 = vmatprep.subr.bf16.mxu1 %v886_v52 }
 0x396   : > { %913 = vmatpush1.bf16.msra.mxu1 %v885_v53 }
 0x397   : > { %v870_v54 = vpop.permute.xlu1 %869  ;;  %v878_v60 = vpop.permute.xlu0 %877 }
 0x398   : > { %v888_v58 = vsel %vm453_vm8, %v868_v50, %v870_v54 }
 0x399   : > { %914 = vmatprep.subr.bf16.mxu1 %v888_v58 }
 0x39a   : > { %915 = vmatpush1.bf16.msra.mxu1 %v887_v61 }
 0x39b   : > { %916 = vmatprep.subr.bf16.mxu1 %v890_v62  ;;  %v872_v63 = vpop.permute.xlu1 %871  ;;  %v882_v5 = vpop.permute.xlu0 %881 }
 0x39c   : > { %v889_v0 = vsel %vm453_vm8, %v872_v63, %v874_v43 }
 0x39e   : > { %917 = vmatpush1.bf16.msra.mxu1 %v889_v0 }
 0x39f   : > { %v880_v6 = vpop.permute.xlu1 %879 }
 0x3a0   : > { %v891_v7 = vsel %vm453_vm8, %v878_v60, %v880_v6  ;;  %v892_v8 = vsel %vm453_vm8, %v880_v6, %v882_v5 }
 0x3a1   : > { %1518 = vmatprep.subr.msk.bf16.mxu1 %vm555_vm10, %v892_v8  ;;  %v905_v9 = vsel %vm555_vm10, %v891_v7, 0 }
 0x3a2   : > { %919 = vmatpush1.bf16.msra.mxu1 %v905_v9 }
 0x3a5   : > { %1519 = vmatmul.mubr.msk.bf16.vlgmr.msra.gmra.mrb[0].mxu1 %vm657_vm1, %v722_v10 }
 0x3a6   : > { %1412 = vmatprep.mubr.bf16.mxu1 %v1573_v2 }
 0x3b0   : > { %v839_v11 = vpop.permute.xlu1 %838 }
 0x478   : > { %v944_v13 = vpop.f32.mrb[0].mxu1 }
 0x479   : > { %v945_v14 = vadd.f32 %v944_v13, %v839_v11  ;;  %v946_v15 = vpop.f32.mrb[1].mxu1 }
 0x47a   : > { %v947_v17 = vadd.f32 %v946_v15, %v839_v11  ;;  %v948_v18 = vpop.f32.mrb[2].mxu1 }
 0x47b   : > { %v951_v16 = vmax.f32 %v945_v14, 0.0  ;;  %v949_v25 = vpop.f32.mrb[3].mxu1 }
 0x47c   : > { %v952_v28 = vmax.f32 %v947_v17, 0.0 }
 0x47d   : > { %v953_v19 = vpack.c.bf16 %v951_v16, %v951_v16 }
 0x47e   : > { %v954_v24 = vpack.c.bf16 %v952_v28, %v952_v28 }
 0x47f   : > { %996 = vrot.lane.b32.xlu0 %v953_v19, %s1580_s21  ;;  %v970_v30 = vrot.slane %v953_v19, 4  ;;  %v958_v2 = vmul.bf16 %v953_v19, %v1706_v33  ;;  %v964_v36 = vmul.bf16 %v953_v19, %v1703_v32  ;;  %v960_v37 = vmul.bf16 %v953_v19, %v1725_v42 }
 0x480   : > { %998 = vrot.lane.b32.xlu1 %v954_v24, %s1580_s21  ;;  %v971_v23 = vrot.slane %v954_v24, 4  ;;  %v959_v35 = vmul.bf16 %v954_v24, %v1695_v26  ;;  %v965_v39 = vmul.bf16 %v954_v24, %v1717_v38  ;;  %v961_v34 = vmul.bf16 %v954_v24, %v1697_v27 }
 0x481   : > { %v988_v40 = vrot.slane %v960_v37, 4  ;;  %v962_v41 = vmul.bf16 %v953_v19, %v1699_v29  ;;  %v963_v44 = vmul.bf16 %v954_v24, %v1737_v49  ;;  %v966_v51 = vmul.bf16 %v953_v19, %v1731_v47 }
 0x482   : > { %v989_v43 = vrot.slane %v961_v34, 4  ;;  %v967_v52 = vmul.bf16 %v954_v24, %v1749_v57  ;;  %v957_v60 = vmul.bf16 %v954_v24, %v1743_v55  ;;  %v956_v7 = vmul.bf16 %v953_v19, %v1754_v59 }
 0x483   : > { %972 = vrot.lane.b32.xlu0 %v970_v30, %s1576_s13  ;;  %v1003_v46 = vrot.slane %v962_v41, 4  ;;  %v1004_v50 = vrot.slane %v963_v44, 4 }
 0x484   : > { %974 = vrot.lane.b32.xlu1 %v971_v23, %s1576_s13 }
 0x487   : > { %980 = vrot.lane.b32.xlu0 %v958_v2, %s1581_s22 }
 0x488   : > { %982 = vrot.lane.b32.xlu1 %v959_v35, %s1581_s22 }
 0x48b   : > { %1013 = vrot.lane.b32.xlu0 %v964_v36, %s1583_s24 }
 0x48c   : > { %1015 = vrot.lane.b32.xlu1 %v965_v39, %s1583_s24 }
 0x48f   : > { %990 = vrot.lane.b32.xlu0 %v988_v40, %s1584_s25 }
 0x490   : > { %992 = vrot.lane.b32.xlu1 %v989_v43, %s1584_s25 }
 0x493   : > { %1005 = vrot.lane.b32.xlu0 %v1003_v46, %s1582_s23 }
 0x494   : > { %1007 = vrot.lane.b32.xlu1 %v1004_v50, %s1582_s23 }
 0x497   : > { %1019 = vrot.lane.b32.xlu0 %v970_v30, %s1585_s26 }
 0x498   : > { %1021 = vrot.lane.b32.xlu1 %v971_v23, %s1585_s26 }
 0x49b   : > { %1027 = vrot.lane.b32.xlu0 %v966_v51, %s1586_s27 }
 0x49c   : > { %1029 = vrot.lane.b32.xlu1 %v967_v52, %s1586_s27 }
 0x4f1   : > { %v997_v53 = vpop.permute.xlu0 %996 }
 0x4f2   : > { %v999_v54 = vpop.permute.xlu1 %998 }
 0x4f3   : > { %v1000_v41 = vsel %vm391_vm9, %v997_v53, %v999_v54 }
 0x4f5   : > { %v973_v58 = vpop.permute.xlu0 %972 }
 0x4f6   : > { %v976_v61 = vsel %vm417_vm6, %v1768_v3, %v973_v58  ;;  %v975_v62 = vpop.permute.xlu1 %974 }
 0x4f7   : > { %v1040_v63 = vsel %vm555_vm10, %v957_v60, %v975_v62  ;;  %v1034_v0 = vsel %vm555_vm10, %v1771_v4, %v976_v61  ;;  %v977_v5 = vsel %vm417_vm6, %v973_v58, %v975_v62 }
 0x4f8   : > { %1090 = vrot.lane.b32.xlu1 %v1040_v63, %s1579_s20  ;;  %1086 = vrot.lane.b32.xlu0 %v1034_v0, %s1579_s20  ;;  %v1037_v9 = vsel %vm555_vm10, %v956_v7, %v977_v5 }
 0x4f9   : > { %v981_v6 = vpop.permute.xlu0 %980 }
 0x4fa   : > { %v983_v8 = vpop.permute.xlu1 %982  ;;  %v984_v36 = vsel %vm484_vm15, %v1786_v12, %v981_v6 }
 0x4fb   : > { %v985_v43 = vsel %vm484_vm15, %v981_v6, %v983_v8 }
 0x4fc   : > { %1088 = vrot.lane.b32.xlu0 %v1037_v9, %s1579_s20 }
 0x4fd   : > { %v1014_v10 = vpop.permute.xlu0 %1013 }
 0x4fe   : > { %v1016_v11 = vpop.permute.xlu1 %1015 }
 0x4ff   : > { %v1017_v28 = vsel %vm531_vm11, %v1014_v10, %v1016_v11  ;;  %v1018_v19 = vsel %vm531_vm11, %v1016_v11, %v1794_v22 }
 0x501   : > { %v991_v13 = vpop.permute.xlu0 %990 }
 0x502   : > { %v993_v14 = vpop.permute.xlu1 %992  ;;  %v994_v35 = vsel %vm499_vm14, %v1790_v20, %v991_v13 }
 0x503   : > { %v1049_v37 = vsel %vm555_vm10, %v983_v8, %v993_v14  ;;  %v1043_v39 = vsel %vm555_vm10, %v984_v36, %v994_v35  ;;  %v995_v34 = vsel %vm499_vm14, %v991_v13, %v993_v14 }
 0x504   : > { %v1046_v44 = vsel %vm555_vm10, %v985_v43, %v995_v34 }
 0x505   : > { %v1006_v15 = vpop.permute.xlu0 %1005 }
 0x506   : > { %v1052_v17 = vsel %vm555_vm10, %v997_v53, %v1006_v15  ;;  %v1008_v18 = vpop.permute.xlu1 %1007 }
 0x507   : > { %1098 = vrot.lane.b32.xlu0 %v1052_v17, %s1579_s20  ;;  %v1009_v40 = vsel %vm519_vm13, %v1006_v15, %v1008_v18  ;;  %v1010_v50 = vsel %vm519_vm13, %v1008_v18, %v1792_v21 }
 0x508   : > { %v1055_v46 = vsel %vm555_vm10, %v1000_v41, %v1009_v40  ;;  %v1058_v52 = vsel %vm555_vm10, %v999_v54, %v1010_v50  ;;  %v1068_v54 = vld [vmem:[%s2170_s6] sm:$0xff] }
 0x509   : > { %v1020_v16 = vpop.permute.xlu0 %1019 }
 0x50a   : > { %v1022_v25 = vpop.permute.xlu1 %1021  ;;  %v1061_v53 = vsel %vm555_vm10, %v1014_v10, %v1020_v16 }
 0x50b   : > { %v1023_v24 = vsel %vm540_vm12, %v1020_v16, %v1022_v25  ;;  %v1024_v30 = vsel %vm540_vm12, %v1022_v25, %v1798_v31 }
 0x50c   : > { %v1064_v23 = vsel %vm555_vm10, %v1017_v28, %v1023_v24  ;;  %v1067_v2 = vsel %vm555_vm10, %v1018_v19, %v1024_v30 }
 0x50d   : > { %1106 = vrot.lane.b32.xlu1 %v1064_v23, %s1579_s20  ;;  %1108 = vrot.lane.b32.xlu0 %v1067_v2, %s1579_s20  ;;  %v1028_v51 = vpop.permute.xlu0 %1027 }
 0x50e   : > { %v1030_v58 = vpop.permute.xlu1 %1029 }
 0x50f   : > { %v1032_v60 = vsel %vm552_vm0, %v1030_v58, %v1820_v56  ;;  %v1031_v61 = vsel %vm552_vm0, %v1028_v51, %v1030_v58 }
 0x511   : > { %1092 = vrot.lane.b32.xlu1 %v1043_v39, %s1579_s20  ;;  %1096 = vrot.lane.b32.xlu0 %v1049_v37, %s1579_s20  ;;  %v955_v39 = vld [vmem:[%s2169_s5] sm:$0xf] }
 0x515   : > { %1094 = vrot.lane.b32.xlu1 %v1046_v44, %s1579_s20  ;;  %1100 = vrot.lane.b32.xlu0 %v1055_v46, %s1579_s20 }
 0x519   : > { %1102 = vrot.lane.b32.xlu1 %v1058_v52, %s1579_s20  ;;  %1110 = vrot.lane.b32.xlu0 %v1028_v51, %s1579_s20 }
 0x51d   : > { %1104 = vrot.lane.b32.xlu1 %v1061_v53, %s1579_s20  ;;  %1114 = vrot.lane.b32.xlu0 %v1032_v60, %s1579_s20 }
 0x521   : > { %1112 = vrot.lane.b32.xlu1 %v1031_v61, %s1579_s20 }
 0x525   : > { %1071 = vperm.xlu1 %1553, %v1068_v54  }
 0x56a   : > { %v1087_v62 = vpop.permute.xlu0 %1086  ;;  %v1091_v63 = vpop.permute.xlu1 %1090 }
 0x56e   : > { %v1089_v0 = vpop.permute.xlu0 %1088 }
 0x56f   : > { %v1116_v5 = vsel %vm453_vm8, %v1087_v62, %v1089_v0  ;;  %v1117_v6 = vsel %vm453_vm8, %v1089_v0, %v1091_v63 }
 0x570   : > { %1143 = vmatprep.subr.bf16.mxu0 %v1117_v6 }
 0x571   : > { %1144 = vmatpush1.bf16.msra.mxu0 %v1116_v5 }
 0x579   : > { %v1099_v7 = vpop.permute.xlu0 %1098 }
 0x57f   : > { %v1107_v8 = vpop.permute.xlu1 %1106  ;;  %v1109_v9 = vpop.permute.xlu0 %1108 }
 0x580   : > { %v1123_v19 = vsel %vm453_vm8, %v1107_v8, %v1109_v9 }
 0x583   : > { %v1093_v10 = vpop.permute.xlu1 %1092  ;;  %v1097_v11 = vpop.permute.xlu0 %1096 }
 0x587   : > { %v1095_v13 = vpop.permute.xlu1 %1094  ;;  %v1101_v14 = vpop.permute.xlu0 %1100 }
 0x588   : > { %v1118_v15 = vsel %vm453_vm8, %v1093_v10, %v1095_v13  ;;  %v1119_v17 = vsel %vm453_vm8, %v1095_v13, %v1097_v11  ;;  %v1120_v25 = vsel %vm453_vm8, %v1099_v7, %v1101_v14 }
 0x589   : > { %1145 = vmatprep.subr.bf16.mxu0 %v1119_v17 }
 0x58a   : > { %1146 = vmatpush1.bf16.msra.mxu0 %v1118_v15 }
 0x58b   : > { %v1103_v18 = vpop.permute.xlu1 %1102  ;;  %v1111_v28 = vpop.permute.xlu0 %1110 }
 0x58c   : > { %v1121_v16 = vsel %vm453_vm8, %v1101_v14, %v1103_v18 }
 0x58d   : > { %1147 = vmatprep.subr.bf16.mxu0 %v1121_v16 }
 0x58e   : > { %1148 = vmatpush1.bf16.msra.mxu0 %v1120_v25 }
 0x58f   : > { %v1105_v24 = vpop.permute.xlu1 %1104  ;;  %1149 = vmatprep.subr.bf16.mxu0 %v1123_v19  ;;  %v1115_v23 = vpop.permute.xlu0 %1114 }
 0x590   : > { %v1122_v30 = vsel %vm453_vm8, %v1105_v24, %v1107_v8 }
 0x592   : > { %1150 = vmatpush1.bf16.msra.mxu0 %v1122_v30 }
 0x593   : > { %v1113_v2 = vpop.permute.xlu1 %1112 }
 0x594   : > { %v1124_v35 = vsel %vm453_vm8, %v1111_v28, %v1113_v2  ;;  %v1125_v36 = vsel %vm453_vm8, %v1113_v2, %v1115_v23 }
 0x595   : > { %v1138_v37 = vsel %vm555_vm10, %v1124_v35, 0  ;;  %1520 = vmatprep.subr.msk.bf16.mxu0 %vm555_vm10, %v1125_v36 }
 0x596   : > { %1152 = vmatpush1.bf16.msra.mxu0 %v1138_v37 }
 0x599   : > { %1521 = vmatmul.mubr.msk.bf16.vlgmr.msra.gmra.mrb[4].mxu0 %vm657_vm1, %v955_v39 }
 0x5a4   : > { %v1072_v34 = vpop.permute.xlu1 %1071 }
 0x66c   : > { %v1177_v40 = vpop.f32.mrb[4].mxu0 }
 0x66d   : > { %v1178_v41 = vadd.f32 %v1177_v40, %v1072_v34  ;;  %v1179_v43 = vpop.f32.mrb[5].mxu0 }
 0x66e   : > { %v1180_v44 = vadd.f32 %v1179_v43, %v1072_v34  ;;  %v1181_v46 = vpop.f32.mrb[6].mxu0 }
 0x66f   : > { %v1184_v50 = vmax.f32 %v1178_v41, 0.0  ;;  %v1182_v51 = vpop.f32.mrb[7].mxu0 }
 0x670   : > { %v1185_v52 = vmax.f32 %v1180_v44, 0.0 }
 0x671   : > { %v1186_v58 = vpack.c.bf16 %v1184_v50, %v1184_v50 }
 0x672   : > { %v1187_v53 = vpack.c.bf16 %v1185_v52, %v1185_v52 }
 0x673   : > { %1229 = vrot.lane.b32.xlu0 %v1186_v58, %s1580_s21  ;;  %v1203_v60 = vrot.slane %v1186_v58, 4  ;;  %v1191_v54 = vmul.bf16 %v1186_v58, %v1706_v33  ;;  %v1197_v63 = vmul.bf16 %v1186_v58, %v1703_v32  ;;  %v1193_v0 = vmul.bf16 %v1186_v58, %v1725_v42 }
 0x674   : > { %1231 = vrot.lane.b32.xlu1 %v1187_v53, %s1580_s21  ;;  %v1204_v61 = vrot.slane %v1187_v53, 4  ;;  %v1192_v62 = vmul.bf16 %v1187_v53, %v1695_v26  ;;  %v1198_v5 = vmul.bf16 %v1187_v53, %v1717_v38  ;;  %v1194_v6 = vmul.bf16 %v1187_v53, %v1697_v27 }
 0x675   : > { %v1221_v7 = vrot.slane %v1193_v0, 4  ;;  %v1195_v33 = vmul.bf16 %v1186_v58, %v1699_v29  ;;  %v1196_v8 = vmul.bf16 %v1187_v53, %v1737_v49  ;;  %v1199_v27 = vmul.bf16 %v1186_v58, %v1731_v47 }
 0x676   : > { %v1222_v26 = vrot.slane %v1194_v6, 4  ;;  %v1200_v29 = vmul.bf16 %v1187_v53, %v1749_v57  ;;  %v1190_v10 = vmul.bf16 %v1187_v53, %v1743_v55  ;;  %v1189_v17 = vmul.bf16 %v1186_v58, %v1754_v59 }
 0x677   : > { %1205 = vrot.lane.b32.xlu0 %v1203_v60, %s1576_s13  ;;  %v1236_v32 = vrot.slane %v1195_v33, 4  ;;  %v1237_v42 = vrot.slane %v1196_v8, 4 }
 0x678   : > { %1207 = vrot.lane.b32.xlu1 %v1204_v61, %s1576_s13 }
 0x67b   : > { %1213 = vrot.lane.b32.xlu0 %v1191_v54, %s1581_s22 }
 0x67c   : > { %1215 = vrot.lane.b32.xlu1 %v1192_v62, %s1581_s22 }
 0x67f   : > { %1246 = vrot.lane.b32.xlu0 %v1197_v63, %s1583_s24 }
 0x680   : > { %1248 = vrot.lane.b32.xlu1 %v1198_v5, %s1583_s24 }
 0x683   : > { %1223 = vrot.lane.b32.xlu0 %v1221_v7, %s1584_s25 }
 0x684   : > { %1225 = vrot.lane.b32.xlu1 %v1222_v26, %s1584_s25 }
 0x687   : > { %1238 = vrot.lane.b32.xlu0 %v1236_v32, %s1582_s23 }
 0x688   : > { %1240 = vrot.lane.b32.xlu1 %v1237_v42, %s1582_s23  ;;  %s334_s23 = scalar_lea.vmem %s2173_s9, %s1528_s14 }
 0x68b   : > { %1252 = vrot.lane.b32.xlu0 %v1203_v60, %s1585_s26 }
 0x68c   : > { %1254 = vrot.lane.b32.xlu1 %v1204_v61, %s1585_s26  ;;  %v1301_v61 = vld [vmem:[#allocation2] sm:$0x1] }
 0x68f   : > { %1260 = vrot.lane.b32.xlu0 %v1199_v27, %s1586_s27 }
 0x690   : > { %1262 = vrot.lane.b32.xlu1 %v1200_v29, %s1586_s27 }
 0x6e5   : > { %v1230_v38 = vpop.permute.xlu0 %1229 }
 0x6e6   : > { %v1232_v49 = vpop.permute.xlu1 %1231 }
 0x6e9   : > { %v1206_v9 = vpop.permute.xlu0 %1205 }
 0x6ea   : > { %v1209_v11 = vsel %vm417_vm6, %v1768_v3, %v1206_v9  ;;  %v1208_v13 = vpop.permute.xlu1 %1207 }
 0x6eb   : > { %v1273_v14 = vsel %vm555_vm10, %v1190_v10, %v1208_v13  ;;  %v1267_v47 = vsel %vm555_vm10, %v1771_v4, %v1209_v11  ;;  %v1210_v57 = vsel %vm417_vm6, %v1206_v9, %v1208_v13 }
 0x6ec   : > { %1327 = vrot.lane.b32.xlu1 %v1273_v14, %s1579_s20  ;;  %1323 = vrot.lane.b32.xlu0 %v1267_v47, %s1579_s20  ;;  %v1270_v55 = vsel %vm555_vm10, %v1189_v17, %v1210_v57 }
 0x6ed   : > { %v1214_v15 = vpop.permute.xlu0 %1213 }
 0x6ee   : > { %v1216_v18 = vpop.permute.xlu1 %1215  ;;  %v1217_v40 = vsel %vm484_vm15, %v1786_v12, %v1214_v15 }
 0x6ef   : > { %v1218_v44 = vsel %vm484_vm15, %v1214_v15, %v1216_v18 }
 0x6f0   : > { %1325 = vrot.lane.b32.xlu0 %v1270_v55, %s1579_s20  ;;  %v1308_v55 = vshrl.u32 %v336_v1, 7 }
 0x6f1   : > { %v1247_v3 = vpop.permute.xlu0 %1246 }
 0x6f2   : > { %v1249_v16 = vpop.permute.xlu1 %1248 }
 0x6f3   : > { %v1250_v2 = vsel %vm531_vm11, %v1247_v3, %v1249_v16  ;;  %v1251_v59 = vsel %vm531_vm11, %v1249_v16, %v1794_v22 }
 0x6f5   : > { %v1224_v25 = vpop.permute.xlu0 %1223 }
 0x6f6   : > { %v1226_v28 = vpop.permute.xlu1 %1225  ;;  %v1227_v34 = vsel %vm499_vm14, %v1790_v20, %v1224_v25  ;;  %v1233_v20 = vsel %vm391_vm9, %v1230_v38, %v1232_v49 }
 0x6f7   : > { %v1282_v22 = vsel %vm555_vm10, %v1216_v18, %v1226_v28  ;;  %v1276_v41 = vsel %vm555_vm10, %v1217_v40, %v1227_v34  ;;  %v1188_v18 = vld [vmem:[%s2171_s7] sm:$0x1] }
 0x6f9   : > { %v1239_v19 = vpop.permute.xlu0 %1238 }
 0x6fa   : > { %v1285_v4 = vsel %vm555_vm10, %v1230_v38, %v1239_v19  ;;  %v1241_v24 = vpop.permute.xlu1 %1240 }
 0x6fb   : > { %1335 = vrot.lane.b32.xlu0 %v1285_v4, %s1579_s20  ;;  %v1242_v43 = vsel %vm519_vm13, %v1239_v19, %v1241_v24  ;;  %v1243_v50 = vsel %vm519_vm13, %v1241_v24, %v1792_v21 }
 0x6fc   : > { %v1288_v12 = vsel %vm555_vm10, %v1233_v20, %v1242_v43  ;;  %v1291_v52 = vsel %vm555_vm10, %v1232_v49, %v1243_v50  ;;  %v1563_v43 = vld [vmem:[%s1667_s18] sm:$0xff] }
 0x6fd   : > { %v1253_v30 = vpop.permute.xlu0 %1252 }
 0x6fe   : > { %v1255_v23 = vpop.permute.xlu1 %1254  ;;  %v1294_v53 = vsel %vm555_vm10, %v1247_v3, %v1253_v30  ;;  %v1309_v3 = vsub.s32 0, %v1308_v55 }
 0x6ff   : > { %v1256_v35 = vsel %vm540_vm12, %v1253_v30, %v1255_v23  ;;  %v1257_v36 = vsel %vm540_vm12, %v1255_v23, %v1798_v31  ;;  %v1228_v31 = vsel %vm499_vm14, %v1224_v25, %v1226_v28 }
 0x700   : > { %v1297_v37 = vsel %vm555_vm10, %v1250_v2, %v1256_v35  ;;  %v1300_v39 = vsel %vm555_vm10, %v1251_v59, %v1257_v36  ;;  %v1279_v46 = vsel %vm555_vm10, %v1218_v44, %v1228_v31  ;;  %v1564_v44 = vld [vmem:[%s1667_s18 + $0x8] sm:$0xff] }
 0x701   : > { %1343 = vrot.lane.b32.xlu1 %v1297_v37, %s1579_s20  ;;  %1345 = vrot.lane.b32.xlu0 %v1300_v39, %s1579_s20  ;;  %v1261_v51 = vpop.permute.xlu0 %1260 }
 0x702   : > { %v1263_v58 = vpop.permute.xlu1 %1262 }
 0x703   : > { %v1265_v60 = vsel %vm552_vm0, %v1263_v58, %v1820_v56  ;;  %v1264_v21 = vsel %vm552_vm0, %v1261_v51, %v1263_v58 }
 0x705   : > { %1329 = vrot.lane.b32.xlu1 %v1276_v41, %s1579_s20  ;;  %1333 = vrot.lane.b32.xlu0 %v1282_v22, %s1579_s20 }
 0x709   : > { %1331 = vrot.lane.b32.xlu1 %v1279_v46, %s1579_s20  ;;  %1337 = vrot.lane.b32.xlu0 %v1288_v12, %s1579_s20 }
 0x70d   : > { %1339 = vrot.lane.b32.xlu1 %v1291_v52, %s1579_s20  ;;  %1347 = vrot.lane.b32.xlu0 %v1261_v51, %s1579_s20 }
 0x711   : > { %1341 = vrot.lane.b32.xlu1 %v1294_v53, %s1579_s20  ;;  %1351 = vrot.lane.b32.xlu0 %v1265_v60, %s1579_s20 }
 0x715   : > { %1349 = vrot.lane.b32.xlu1 %v1264_v21, %s1579_s20 }
 0x719   : > { %1304 = vperm.xlu1 %1553, %v1301_v61  }
 0x75e   : > { %v1324_v54 = vpop.permute.xlu0 %1323  ;;  %v1328_v62 = vpop.permute.xlu1 %1327 }
 0x762   : > { %v1326_v63 = vpop.permute.xlu0 %1325 }
 0x763   : > { %v1353_v0 = vsel %vm453_vm8, %v1324_v54, %v1326_v63  ;;  %v1354_v5 = vsel %vm453_vm8, %v1326_v63, %v1328_v62 }
 0x764   : > { %1380 = vmatprep.subr.bf16.mxu1 %v1354_v5 }
 0x765   : > { %1381 = vmatpush1.bf16.msra.mxu1 %v1353_v0 }
 0x76d   : > { %v1336_v56 = vpop.permute.xlu0 %1335 }
 0x773   : > { %v1344_v6 = vpop.permute.xlu1 %1343  ;;  %v1346_v7 = vpop.permute.xlu0 %1345 }
 0x774   : > { %v1360_v10 = vsel %vm453_vm8, %v1344_v6, %v1346_v7 }
 0x777   : > { %v1330_v33 = vpop.permute.xlu1 %1329  ;;  %v1334_v26 = vpop.permute.xlu0 %1333 }
 0x77b   : > { %v1332_v8 = vpop.permute.xlu1 %1331  ;;  %v1338_v32 = vpop.permute.xlu0 %1337 }
 0x77c   : > { %v1355_v42 = vsel %vm453_vm8, %v1330_v33, %v1332_v8  ;;  %v1356_v27 = vsel %vm453_vm8, %v1332_v8, %v1334_v26  ;;  %v1357_v49 = vsel %vm453_vm8, %v1336_v56, %v1338_v32 }
 0x77d   : > { %1382 = vmatprep.subr.bf16.mxu1 %v1356_v27 }
 0x77e   : > { %1383 = vmatpush1.bf16.msra.mxu1 %v1355_v42 }
 0x77f   : > { %v1340_v29 = vpop.permute.xlu1 %1339  ;;  %v1348_v9 = vpop.permute.xlu0 %1347 }
 0x780   : > { %v1358_v38 = vsel %vm453_vm8, %v1338_v32, %v1340_v29 }
 0x781   : > { %1384 = vmatprep.subr.bf16.mxu1 %v1358_v38 }
 0x782   : > { %1385 = vmatpush1.bf16.msra.mxu1 %v1357_v49 }
 0x783   : > { %v1342_v11 = vpop.permute.xlu1 %1341  ;;  %1386 = vmatprep.subr.bf16.mxu1 %v1360_v10  ;;  %v1352_v14 = vpop.permute.xlu0 %1351 }
 0x784   : > { %v1359_v13 = vsel %vm453_vm8, %v1342_v11, %v1344_v6 }
 0x786   : > { %1387 = vmatpush1.bf16.msra.mxu1 %v1359_v13 }
 0x787   : > { %v1350_v47 = vpop.permute.xlu1 %1349 }
 0x788   : > { %v1361_v57 = vsel %vm453_vm8, %v1348_v9, %v1350_v47  ;;  %v1362_v15 = vsel %vm453_vm8, %v1350_v47, %v1352_v14 }
 0x789   : > { %v1375_v17 = vsel %vm555_vm10, %v1361_v57, 0  ;;  %1522 = vmatprep.subr.msk.bf16.mxu1 %vm555_vm10, %v1362_v15 }
 0x78a   : > { %1389 = vmatpush1.bf16.msra.mxu1 %v1375_v17 }
 0x78d   : > { %1523 = vmatmul.mubr.msk.bf16.vlgmr.msra.gmra.mrb[4].mxu1 %vm657_vm1, %v1188_v18 }
 0x798   : > { %v1305_v16 = vpop.permute.xlu1 %1304 }
 0x799   : > { %v1310_v25 = vrot.slane %v1305_v16, %v1309_v3 }
 0x860   : > { %v1414_v28 = vpop.f32.mrb[4].mxu1 }
 0x861   : > { %v1415_v19 = vadd.f32 %v1414_v28, %v1310_v25  ;;  %v1416_v4 = vpop.f32.mrb[5].mxu1 }
 0x862   : > { %v1417_v24 = vadd.f32 %v1416_v4, %v1310_v25  ;;  %v1418_v30 = vpop.f32.mrb[6].mxu1 }
 0x863   : > { %v1524_v23 = vmul.f32 -1.442695, %v1415_v19  ;;  %v1419_v2 = vpop.f32.mrb[7].mxu1 }
 0x864   : > { %v1525_v59 = vmul.f32 -1.442695, %v1417_v24 }
 0x865   : > { %1555 = vpow2.f32 %v1524_v23 }
 0x866   : > { %1557 = vpow2.f32 %v1525_v59 }
 0x86f   : > { %v1556_v35 = vpop.eup %1555 }
 0x870   : > { %v1558_v36 = vpop.eup %1557  ;;  %v1427_v37 = vadd.f32 1.0, %v1556_v35 }
 0x871   : > { %v1428_v1 = vadd.f32 1.0, %v1558_v36 }
 0x872   : > { %1559 = vrcp.f32 %v1427_v37 }
 0x873   : > { %1561 = vrcp.f32 %v1428_v1 }
 0x87c   : > { %v1560_v39 = vpop.eup %1559 }
 0x87d   : > { %v1562_v34 = vpop.eup %1561  ;;  %v1436_v40 = vrot.slane %v1560_v39, %v1309_v3 }
 0x87e   : > { %v1440_v22 = vrot.slane %v1562_v34, %v1309_v3 }
 0x87f   : > { %v1441_v41 = vmul.f32 %v1436_v40, %v1858_v45 }
 0x880   : > { %v1442_v31 = vmul.f32 %v1440_v22, %v1860_v48 }
 0x881   : > { %v1443_v20 = vadd.f32 %v1563_v43, %v1441_v41 }
 0x882   : > { %v1444_v46 = vadd.f32 %v1564_v44, %v1442_v31 }
 0x883   : > { %1445 = vst [vmem:[%s334_s23] sm:$0xff] %v1443_v20 }
 0x884   : > { %1446 = vst [vmem:[%s334_s23 + $0x8] sm:$0xff] %v1444_v46 }
 0x885 PF: > { %s21_s11 = sadd.s32 1, %s1571_s11  }
 0x886   : > { %p18_p4 = scmp.ge.s32.totalorder %s21_s11, 4  }
 0x888   :  { %20 = sbr.rel (!%p18_p4) target bundleno = 3 (0x3), region = 86 }

</bundles_post_ra>
